<compile_context>
chip_gen: v7x
topology: tpu7x:2x2x1
jax: 0.10.0
libtpu: 0.0.40
codegen_flags: <defaults>
</compile_context>

<pallas_src>
import jax
import jax.numpy as jnp
from jax.experimental import pallas as pl
from jax.experimental.pallas import tpu as pltpu  # noqa: F401  (imported per template)


def _lstm2_fc_kernel(tok_ref,    # (T*Bp, 1) int32  time-major flattened tokens (batch-padded)
                     emb_ref,    # (V_pad, E)       embedding table, zero-padded rows
                     wih1_ref,   # (E, 4H)
                     whh1_ref,   # (H, 4H)
                     b1_ref,     # (1, 4H)   bih_l0 + bhh_l0
                     wih2_ref,   # (H, 4H)
                     whh2_ref,   # (H, 4H)
                     b2_ref,     # (1, 4H)   bih_l1 + bhh_l1
                     wfc_ref,    # (1, H)
                     bfc_ref,    # (1, 1)
                     out_ref):   # (Bp, 128) lane-dense sigmoid output (column 0 is real)
    H = whh1_ref.shape[0]
    Bp = out_ref.shape[0]
    TB = tok_ref.shape[0]
    T = TB // Bp
    V = emb_ref.shape[0]

    # ---- in-kernel embedding gather (one-hot @ table on the MXU) + hoisted wih1
    #      projection; all off the serial recurrence path.
    toks = tok_ref[...]                                                     # (TB, 1) i32
    vocab_iota = jax.lax.broadcasted_iota(jnp.int32, (TB, V), dimension=1)  # (TB, V)
    onehot = (vocab_iota == toks).astype(jnp.float32)                       # (TB, V)
    x = jnp.dot(onehot, emb_ref[...], preferred_element_type=jnp.float32)   # (TB, E)
    gx = jnp.dot(x, wih1_ref[...],
                 preferred_element_type=jnp.float32) + b1_ref[...]          # (TB, 4H)

    # ---- loads / broadcasts hoisted out of the unrolled time loop.
    whh1 = whh1_ref[...]                                                    # (H, 4H)
    wih2 = wih2_ref[...]                                                    # (H, 4H)
    whh2 = whh2_ref[...]                                                    # (H, 4H)
    b2 = jnp.broadcast_to(b2_ref[...], (Bp, 4 * H))                         # (Bp, 4H)

    # Lane mask selecting the g (cell-candidate) block [2H, 3H).
    lane = jax.lax.broadcasted_iota(jnp.int32, (Bp, 4 * H), dimension=1)
    g_mask = (lane >= 2 * H) & (lane < 3 * H)

    def gate_act(gates):
        # Single EUP pass: tanh(x) = 2*sigmoid(2x) - 1 on the g lanes, sigmoid elsewhere.
        scaled = jnp.where(g_mask, gates * 2.0, gates)
        s = jax.nn.sigmoid(scaled)
        act = jnp.where(g_mask, 2.0 * s - 1.0, s)
        return (act[:, 0 * H:1 * H], act[:, 1 * H:2 * H],
                act[:, 2 * H:3 * H], act[:, 3 * H:4 * H])

    zeros = jnp.zeros((Bp, H), jnp.float32)
    h1, c1, h2, c2 = zeros, zeros, zeros, zeros

    # ---- fully-unrolled recurrence (T is static & tiny); h/c stay in vregs.
    for t in range(T):
        # Both recurrent matmuls use only t-1 state -> issue in parallel (off each
        # other's critical path); no concat.
        r1 = jnp.dot(h1, whh1, preferred_element_type=jnp.float32)          # (Bp, 4H)
        r2 = jnp.dot(h2, whh2, preferred_element_type=jnp.float32)          # (Bp, 4H)

        # Layer 1: gx already holds x_t @ W_ih1 + (b_ih + b_hh).
        gates1 = gx[t * Bp:(t + 1) * Bp, :] + r1
        i1, f1, g1, o1 = gate_act(gates1)
        c1 = f1 * c1 + i1 * g1
        h1 = o1 * jnp.tanh(c1)

        # Layer 2: only the wih2 matmul (depends on h1_t) sits on the serial chain.
        gates2 = jnp.dot(h1, wih2, preferred_element_type=jnp.float32) + r2 + b2
        i2, f2, g2, o2 = gate_act(gates2)
        c2 = f2 * c2 + i2 * g2
        h2 = o2 * jnp.tanh(c2)

    # ---- fc + sigmoid: VPU multiply + lane reduction; lane-dense unmasked store.
    logit = jnp.sum(h2 * wfc_ref[...], axis=-1, keepdims=True) + bfc_ref[...]  # (Bp, 1)
    prob = jax.nn.sigmoid(logit)
    out_ref[...] = jnp.broadcast_to(prob, out_ref.shape)


def password_rnn_forward(tokens, params):
    """tokens: (B, T) int32.  Returns sigmoid(fc(h_layer2_final)) of shape (B, 1)."""
    emb_table = params["embedding"]                 # (vocab, E), row 0 == 0 (padding_idx)
    vocab, E = emb_table.shape
    H = params["whh_l0"].shape[1]                   # whh_l0 is (4H, H)
    B, T = tokens.shape

    B_pad = ((B + 7) // 8) * 8                      # full sublane group
    V_pad = ((vocab + 127) // 128) * 128            # MXU-friendly contraction dim
    V_pad = max(V_pad, 128)

    # --- glue: only tiny integer layout work + weight transposes (no gather, no HBM
    #     round-trip of embedded activations) ---
    tok_tm = jnp.transpose(tokens, (1, 0))                                # (T, B)
    tok_tm = jnp.pad(tok_tm, ((0, 0), (0, B_pad - B)))                    # pad with token 0
    tok_flat = tok_tm.reshape(T * B_pad, 1).astype(jnp.int32)             # (T*B_pad, 1)

    emb_pad = jnp.pad(emb_table.astype(jnp.float32),
                      ((0, V_pad - vocab), (0, 0)))                       # (V_pad, E)

    wih1 = params["wih_l0"].T.astype(jnp.float32)                         # (E, 4H)
    whh1 = params["whh_l0"].T.astype(jnp.float32)                         # (H, 4H)
    b1 = (params["bih_l0"] + params["bhh_l0"]).reshape(1, 4 * H).astype(jnp.float32)
    wih2 = params["wih_l1"].T.astype(jnp.float32)                         # (H, 4H)
    whh2 = params["whh_l1"].T.astype(jnp.float32)                         # (H, 4H)
    b2 = (params["bih_l1"] + params["bhh_l1"]).reshape(1, 4 * H).astype(jnp.float32)
    wfc = params["fc_w"].reshape(1, H).astype(jnp.float32)                # (1, H)
    bfc = params["fc_b"].reshape(1, 1).astype(jnp.float32)                # (1, 1)

    # Single-invocation kernel: every operand lives whole in VMEM (~70 KB total).
    # TODO(synk): for T*B_pad >= ~512 rows, stage gx in VMEM scratch / tile batch over
    # a parallel grid instead of fully unrolling (v7x vreg-file / 2nd-TC scaling note).
    out_full = pl.pallas_call(
        _lstm2_fc_kernel,
        out_shape=jax.ShapeDtypeStruct((B_pad, 128), jnp.float32),
    )(tok_flat, emb_pad, wih1, whh1, b1, wih2, whh2, b2, wfc, bfc)

    return out_full[:B, :1]                                               # (B, 1)


def init_params(key, vocab_size, embedding_dim=16, hidden_dim=32):
    ks = jax.random.split(key, 12)
    H, E = hidden_dim, embedding_dim
    s = 0.1
    emb = s * jax.random.normal(ks[0], (vocab_size, E), jnp.float32)
    emb = emb.at[0].set(0.0)                        # padding_idx=0
    return {
        "embedding": emb,
        "wih_l0": s * jax.random.normal(ks[1], (4 * H, E), jnp.float32),
        "whh_l0": s * jax.random.normal(ks[2], (4 * H, H), jnp.float32),
        "bih_l0": s * jax.random.normal(ks[3], (4 * H,), jnp.float32),
        "bhh_l0": s * jax.random.normal(ks[4], (4 * H,), jnp.float32),
        "wih_l1": s * jax.random.normal(ks[5], (4 * H, H), jnp.float32),
        "whh_l1": s * jax.random.normal(ks[6], (4 * H, H), jnp.float32),
        "bih_l1": s * jax.random.normal(ks[7], (4 * H,), jnp.float32),
        "bhh_l1": s * jax.random.normal(ks[8], (4 * H,), jnp.float32),
        "fc_w": s * jax.random.normal(ks[9], (1, H), jnp.float32),
        "fc_b": s * jax.random.normal(ks[10], (1,), jnp.float32),
    }


if __name__ == "__main__":
    VOCAB, E, H = 50, 16, 32
    B, T = 2, 8

    key = jax.random.PRNGKey(0)
    k_in, k_par = jax.random.split(key)
    tokens = jax.random.randint(k_in, (B, T), 0, VOCAB, dtype=jnp.int32)
    params = init_params(k_par, VOCAB, E, H)

    out = password_rnn_forward(tokens, params)
    out = jax.block_until_ready(out)
    assert out.shape == (B, 1) and out.dtype == jnp.float32
    print("KERNEL_OK")
</pallas_src>

<mosaic_0001>
module attributes {stable_mosaic.version = 11 : i64} {
  func.func @_lstm2_fc_kernel(%arg0: memref<64x1xi32, #tpu.memory_space<vmem>>, %arg1: memref<128x16xf32, #tpu.memory_space<vmem>>, %arg2: memref<16x128xf32, #tpu.memory_space<vmem>>, %arg3: memref<32x128xf32, #tpu.memory_space<vmem>>, %arg4: memref<1x128xf32, #tpu.memory_space<vmem>>, %arg5: memref<32x128xf32, #tpu.memory_space<vmem>>, %arg6: memref<32x128xf32, #tpu.memory_space<vmem>>, %arg7: memref<1x128xf32, #tpu.memory_space<vmem>>, %arg8: memref<1x32xf32, #tpu.memory_space<vmem>>, %arg9: memref<1x1xf32, #tpu.memory_space<vmem>>, %arg10: memref<8x128xf32, #tpu.memory_space<vmem>>) attributes {dimension_semantics = [], scalar_prefetch = 0 : i64, scratch_operands = 0 : i64, tpu.core_type = #tpu.core_type<tc>} {
    %c0 = arith.constant 0 : index
    %c0_0 = arith.constant 0 : index
    %0 = vector.load %arg0[%c0, %c0_0] : memref<64x1xi32, #tpu.memory_space<vmem>>, vector<64x1xi32>
    %1 = tpu.iota {dimensions = array<i32: 1>} : vector<64x128xi32>
    %2 = vector.broadcast %0 : vector<64x1xi32> to vector<64x128xi32>
    %3 = arith.cmpi eq, %1, %2 : vector<64x128xi32>
    %4 = arith.extui %3 : vector<64x128xi1> to vector<64x128xi32>
    %5 = arith.sitofp %4 : vector<64x128xi32> to vector<64x128xf32>
    %c0_1 = arith.constant 0 : index
    %c0_2 = arith.constant 0 : index
    %6 = vector.load %arg1[%c0_1, %c0_2] : memref<128x16xf32, #tpu.memory_space<vmem>>, vector<128x16xf32>
    %cst = arith.constant dense<0.000000e+00> : vector<64x16xf32>
    %7 = tpu.matmul %5, %6, %cst {dimension_numbers = #tpu.dot_dimension_numbers<[1], [0], [0], [1], [0, 0, 1, 1], [], []>} : vector<64x128xf32>, vector<128x16xf32>, vector<64x16xf32> -> vector<64x16xf32>
    %c0_3 = arith.constant 0 : index
    %c0_4 = arith.constant 0 : index
    %8 = vector.load %arg2[%c0_3, %c0_4] : memref<16x128xf32, #tpu.memory_space<vmem>>, vector<16x128xf32>
    %cst_5 = arith.constant dense<0.000000e+00> : vector<64x128xf32>
    %9 = tpu.matmul %7, %8, %cst_5 {dimension_numbers = #tpu.dot_dimension_numbers<[1], [0], [0], [1], [0, 0, 1, 1], [], []>} : vector<64x16xf32>, vector<16x128xf32>, vector<64x128xf32> -> vector<64x128xf32>
    %c0_6 = arith.constant 0 : index
    %c0_7 = arith.constant 0 : index
    %10 = vector.load %arg4[%c0_6, %c0_7] : memref<1x128xf32, #tpu.memory_space<vmem>>, vector<1x128xf32>
    %11 = vector.broadcast %10 : vector<1x128xf32> to vector<64x128xf32>
    %12 = arith.addf %9, %11 : vector<64x128xf32>
    %c0_8 = arith.constant 0 : index
    %c0_9 = arith.constant 0 : index
    %13 = vector.load %arg3[%c0_8, %c0_9] : memref<32x128xf32, #tpu.memory_space<vmem>>, vector<32x128xf32>
    %c0_10 = arith.constant 0 : index
    %c0_11 = arith.constant 0 : index
    %14 = vector.load %arg5[%c0_10, %c0_11] : memref<32x128xf32, #tpu.memory_space<vmem>>, vector<32x128xf32>
    %c0_12 = arith.constant 0 : index
    %c0_13 = arith.constant 0 : index
    %15 = vector.load %arg6[%c0_12, %c0_13] : memref<32x128xf32, #tpu.memory_space<vmem>>, vector<32x128xf32>
    %c0_14 = arith.constant 0 : index
    %c0_15 = arith.constant 0 : index
    %16 = vector.load %arg7[%c0_14, %c0_15] : memref<1x128xf32, #tpu.memory_space<vmem>>, vector<1x128xf32>
    %17 = vector.shape_cast %16 : vector<1x128xf32> to vector<1x128xf32>
    %18 = vector.broadcast %17 : vector<1x128xf32> to vector<8x128xf32>
    %19 = tpu.iota {dimensions = array<i32: 1>} : vector<8x128xi32>
    %c64_i32 = arith.constant 64 : i32
    %20 = vector.broadcast %c64_i32 : i32 to vector<8x128xi32>
    %21 = arith.cmpi sge, %19, %20 : vector<8x128xi32>
    %c96_i32 = arith.constant 96 : i32
    %22 = vector.broadcast %c96_i32 : i32 to vector<8x128xi32>
    %23 = arith.cmpi slt, %19, %22 : vector<8x128xi32>
    %24 = arith.andi %21, %23 : vector<8x128xi1>
    %cst_16 = arith.constant 0.000000e+00 : f32
    %25 = vector.broadcast %cst_16 : f32 to vector<8x32xf32>
    %cst_17 = arith.constant dense<0.000000e+00> : vector<8x128xf32>
    %26 = tpu.matmul %25, %13, %cst_17 {dimension_numbers = #tpu.dot_dimension_numbers<[1], [0], [0], [1], [0, 0, 1, 1], [], []>} : vector<8x32xf32>, vector<32x128xf32>, vector<8x128xf32> -> vector<8x128xf32>
    %cst_18 = arith.constant dense<0.000000e+00> : vector<8x128xf32>
    %27 = tpu.matmul %25, %15, %cst_18 {dimension_numbers = #tpu.dot_dimension_numbers<[1], [0], [0], [1], [0, 0, 1, 1], [], []>} : vector<8x32xf32>, vector<32x128xf32>, vector<8x128xf32> -> vector<8x128xf32>
    %28 = vector.extract_strided_slice %12 {offsets = [0, 0], sizes = [8, 128], strides = [1, 1]} : vector<64x128xf32> to vector<8x128xf32>
    %29 = arith.addf %28, %26 : vector<8x128xf32>
    %cst_19 = arith.constant 2.000000e+00 : f32
    %30 = vector.broadcast %cst_19 : f32 to vector<8x128xf32>
    %31 = arith.mulf %29, %30 : vector<8x128xf32>
    %32 = arith.select %24, %31, %29 : vector<8x128xi1>, vector<8x128xf32>
    %33 = arith.negf %32 : vector<8x128xf32>
    %34 = math.exp %33 : vector<8x128xf32>
    %cst_20 = arith.constant 1.000000e+00 : f32
    %35 = vector.broadcast %cst_20 : f32 to vector<8x128xf32>
    %36 = arith.addf %35, %34 : vector<8x128xf32>
    %37 = arith.divf %35, %36 : vector<8x128xf32>
    %cst_21 = arith.constant 2.000000e+00 : f32
    %38 = vector.broadcast %cst_21 : f32 to vector<8x128xf32>
    %39 = arith.mulf %38, %37 : vector<8x128xf32>
    %cst_22 = arith.constant 1.000000e+00 : f32
    %40 = vector.broadcast %cst_22 : f32 to vector<8x128xf32>
    %41 = arith.subf %39, %40 : vector<8x128xf32>
    %42 = arith.select %24, %41, %37 : vector<8x128xi1>, vector<8x128xf32>
    %43 = vector.extract_strided_slice %42 {offsets = [0, 0], sizes = [8, 32], strides = [1, 1]} : vector<8x128xf32> to vector<8x32xf32>
    %44 = vector.extract_strided_slice %42 {offsets = [0, 32], sizes = [8, 32], strides = [1, 1]} : vector<8x128xf32> to vector<8x32xf32>
    %45 = vector.extract_strided_slice %42 {offsets = [0, 64], sizes = [8, 32], strides = [1, 1]} : vector<8x128xf32> to vector<8x32xf32>
    %46 = vector.extract_strided_slice %42 {offsets = [0, 96], sizes = [8, 32], strides = [1, 1]} : vector<8x128xf32> to vector<8x32xf32>
    %47 = arith.mulf %44, %25 : vector<8x32xf32>
    %48 = arith.mulf %43, %45 : vector<8x32xf32>
    %49 = arith.addf %47, %48 : vector<8x32xf32>
    %50 = math.tanh %49 : vector<8x32xf32>
    %51 = arith.mulf %46, %50 : vector<8x32xf32>
    %cst_23 = arith.constant dense<0.000000e+00> : vector<8x128xf32>
    %52 = tpu.matmul %51, %14, %cst_23 {dimension_numbers = #tpu.dot_dimension_numbers<[1], [0], [0], [1], [0, 0, 1, 1], [], []>} : vector<8x32xf32>, vector<32x128xf32>, vector<8x128xf32> -> vector<8x128xf32>
    %53 = arith.addf %52, %27 : vector<8x128xf32>
    %54 = arith.addf %53, %18 : vector<8x128xf32>
    %cst_24 = arith.constant 2.000000e+00 : f32
    %55 = vector.broadcast %cst_24 : f32 to vector<8x128xf32>
    %56 = arith.mulf %54, %55 : vector<8x128xf32>
    %57 = arith.select %24, %56, %54 : vector<8x128xi1>, vector<8x128xf32>
    %58 = arith.negf %57 : vector<8x128xf32>
    %59 = math.exp %58 : vector<8x128xf32>
    %cst_25 = arith.constant 1.000000e+00 : f32
    %60 = vector.broadcast %cst_25 : f32 to vector<8x128xf32>
    %61 = arith.addf %60, %59 : vector<8x128xf32>
    %62 = arith.divf %60, %61 : vector<8x128xf32>
    %cst_26 = arith.constant 2.000000e+00 : f32
    %63 = vector.broadcast %cst_26 : f32 to vector<8x128xf32>
    %64 = arith.mulf %63, %62 : vector<8x128xf32>
    %cst_27 = arith.constant 1.000000e+00 : f32
    %65 = vector.broadcast %cst_27 : f32 to vector<8x128xf32>
    %66 = arith.subf %64, %65 : vector<8x128xf32>
    %67 = arith.select %24, %66, %62 : vector<8x128xi1>, vector<8x128xf32>
    %68 = vector.extract_strided_slice %67 {offsets = [0, 0], sizes = [8, 32], strides = [1, 1]} : vector<8x128xf32> to vector<8x32xf32>
    %69 = vector.extract_strided_slice %67 {offsets = [0, 32], sizes = [8, 32], strides = [1, 1]} : vector<8x128xf32> to vector<8x32xf32>
    %70 = vector.extract_strided_slice %67 {offsets = [0, 64], sizes = [8, 32], strides = [1, 1]} : vector<8x128xf32> to vector<8x32xf32>
    %71 = vector.extract_strided_slice %67 {offsets = [0, 96], sizes = [8, 32], strides = [1, 1]} : vector<8x128xf32> to vector<8x32xf32>
    %72 = arith.mulf %69, %25 : vector<8x32xf32>
    %73 = arith.mulf %68, %70 : vector<8x32xf32>
    %74 = arith.addf %72, %73 : vector<8x32xf32>
    %75 = math.tanh %74 : vector<8x32xf32>
    %76 = arith.mulf %71, %75 : vector<8x32xf32>
    %cst_28 = arith.constant dense<0.000000e+00> : vector<8x128xf32>
    %77 = tpu.matmul %51, %13, %cst_28 {dimension_numbers = #tpu.dot_dimension_numbers<[1], [0], [0], [1], [0, 0, 1, 1], [], []>} : vector<8x32xf32>, vector<32x128xf32>, vector<8x128xf32> -> vector<8x128xf32>
    %cst_29 = arith.constant dense<0.000000e+00> : vector<8x128xf32>
    %78 = tpu.matmul %76, %15, %cst_29 {dimension_numbers = #tpu.dot_dimension_numbers<[1], [0], [0], [1], [0, 0, 1, 1], [], []>} : vector<8x32xf32>, vector<32x128xf32>, vector<8x128xf32> -> vector<8x128xf32>
    %79 = vector.extract_strided_slice %12 {offsets = [8, 0], sizes = [8, 128], strides = [1, 1]} : vector<64x128xf32> to vector<8x128xf32>
    %80 = arith.addf %79, %77 : vector<8x128xf32>
    %cst_30 = arith.constant 2.000000e+00 : f32
    %81 = vector.broadcast %cst_30 : f32 to vector<8x128xf32>
    %82 = arith.mulf %80, %81 : vector<8x128xf32>
    %83 = arith.select %24, %82, %80 : vector<8x128xi1>, vector<8x128xf32>
    %84 = arith.negf %83 : vector<8x128xf32>
    %85 = math.exp %84 : vector<8x128xf32>
    %cst_31 = arith.constant 1.000000e+00 : f32
    %86 = vector.broadcast %cst_31 : f32 to vector<8x128xf32>
    %87 = arith.addf %86, %85 : vector<8x128xf32>
    %88 = arith.divf %86, %87 : vector<8x128xf32>
    %cst_32 = arith.constant 2.000000e+00 : f32
    %89 = vector.broadcast %cst_32 : f32 to vector<8x128xf32>
    %90 = arith.mulf %89, %88 : vector<8x128xf32>
    %cst_33 = arith.constant 1.000000e+00 : f32
    %91 = vector.broadcast %cst_33 : f32 to vector<8x128xf32>
    %92 = arith.subf %90, %91 : vector<8x128xf32>
    %93 = arith.select %24, %92, %88 : vector<8x128xi1>, vector<8x128xf32>
    %94 = vector.extract_strided_slice %93 {offsets = [0, 0], sizes = [8, 32], strides = [1, 1]} : vector<8x128xf32> to vector<8x32xf32>
    %95 = vector.extract_strided_slice %93 {offsets = [0, 32], sizes = [8, 32], strides = [1, 1]} : vector<8x128xf32> to vector<8x32xf32>
    %96 = vector.extract_strided_slice %93 {offsets = [0, 64], sizes = [8, 32], strides = [1, 1]} : vector<8x128xf32> to vector<8x32xf32>
    %97 = vector.extract_strided_slice %93 {offsets = [0, 96], sizes = [8, 32], strides = [1, 1]} : vector<8x128xf32> to vector<8x32xf32>
    %98 = arith.mulf %95, %49 : vector<8x32xf32>
    %99 = arith.mulf %94, %96 : vector<8x32xf32>
    %100 = arith.addf %98, %99 : vector<8x32xf32>
    %101 = math.tanh %100 : vector<8x32xf32>
    %102 = arith.mulf %97, %101 : vector<8x32xf32>
    %cst_34 = arith.constant dense<0.000000e+00> : vector<8x128xf32>
    %103 = tpu.matmul %102, %14, %cst_34 {dimension_numbers = #tpu.dot_dimension_numbers<[1], [0], [0], [1], [0, 0, 1, 1], [], []>} : vector<8x32xf32>, vector<32x128xf32>, vector<8x128xf32> -> vector<8x128xf32>
    %104 = arith.addf %103, %78 : vector<8x128xf32>
    %105 = arith.addf %104, %18 : vector<8x128xf32>
    %cst_35 = arith.constant 2.000000e+00 : f32
    %106 = vector.broadcast %cst_35 : f32 to vector<8x128xf32>
    %107 = arith.mulf %105, %106 : vector<8x128xf32>
    %108 = arith.select %24, %107, %105 : vector<8x128xi1>, vector<8x128xf32>
    %109 = arith.negf %108 : vector<8x128xf32>
    %110 = math.exp %109 : vector<8x128xf32>
    %cst_36 = arith.constant 1.000000e+00 : f32
    %111 = vector.broadcast %cst_36 : f32 to vector<8x128xf32>
    %112 = arith.addf %111, %110 : vector<8x128xf32>
    %113 = arith.divf %111, %112 : vector<8x128xf32>
    %cst_37 = arith.constant 2.000000e+00 : f32
    %114 = vector.broadcast %cst_37 : f32 to vector<8x128xf32>
    %115 = arith.mulf %114, %113 : vector<8x128xf32>
    %cst_38 = arith.constant 1.000000e+00 : f32
    %116 = vector.broadcast %cst_38 : f32 to vector<8x128xf32>
    %117 = arith.subf %115, %116 : vector<8x128xf32>
    %118 = arith.select %24, %117, %113 : vector<8x128xi1>, vector<8x128xf32>
    %119 = vector.extract_strided_slice %118 {offsets = [0, 0], sizes = [8, 32], strides = [1, 1]} : vector<8x128xf32> to vector<8x32xf32>
    %120 = vector.extract_strided_slice %118 {offsets = [0, 32], sizes = [8, 32], strides = [1, 1]} : vector<8x128xf32> to vector<8x32xf32>
    %121 = vector.extract_strided_slice %118 {offsets = [0, 64], sizes = [8, 32], strides = [1, 1]} : vector<8x128xf32> to vector<8x32xf32>
    %122 = vector.extract_strided_slice %118 {offsets = [0, 96], sizes = [8, 32], strides = [1, 1]} : vector<8x128xf32> to vector<8x32xf32>
    %123 = arith.mulf %120, %74 : vector<8x32xf32>
    %124 = arith.mulf %119, %121 : vector<8x32xf32>
    %125 = arith.addf %123, %124 : vector<8x32xf32>
    %126 = math.tanh %125 : vector<8x32xf32>
    %127 = arith.mulf %122, %126 : vector<8x32xf32>
    %cst_39 = arith.constant dense<0.000000e+00> : vector<8x128xf32>
    %128 = tpu.matmul %102, %13, %cst_39 {dimension_numbers = #tpu.dot_dimension_numbers<[1], [0], [0], [1], [0, 0, 1, 1], [], []>} : vector<8x32xf32>, vector<32x128xf32>, vector<8x128xf32> -> vector<8x128xf32>
    %cst_40 = arith.constant dense<0.000000e+00> : vector<8x128xf32>
    %129 = tpu.matmul %127, %15, %cst_40 {dimension_numbers = #tpu.dot_dimension_numbers<[1], [0], [0], [1], [0, 0, 1, 1], [], []>} : vector<8x32xf32>, vector<32x128xf32>, vector<8x128xf32> -> vector<8x128xf32>
    %130 = vector.extract_strided_slice %12 {offsets = [16, 0], sizes = [8, 128], strides = [1, 1]} : vector<64x128xf32> to vector<8x128xf32>
    %131 = arith.addf %130, %128 : vector<8x128xf32>
    %cst_41 = arith.constant 2.000000e+00 : f32
    %132 = vector.broadcast %cst_41 : f32 to vector<8x128xf32>
    %133 = arith.mulf %131, %132 : vector<8x128xf32>
    %134 = arith.select %24, %133, %131 : vector<8x128xi1>, vector<8x128xf32>
    %135 = arith.negf %134 : vector<8x128xf32>
    %136 = math.exp %135 : vector<8x128xf32>
    %cst_42 = arith.constant 1.000000e+00 : f32
    %137 = vector.broadcast %cst_42 : f32 to vector<8x128xf32>
    %138 = arith.addf %137, %136 : vector<8x128xf32>
    %139 = arith.divf %137, %138 : vector<8x128xf32>
    %cst_43 = arith.constant 2.000000e+00 : f32
    %140 = vector.broadcast %cst_43 : f32 to vector<8x128xf32>
    %141 = arith.mulf %140, %139 : vector<8x128xf32>
    %cst_44 = arith.constant 1.000000e+00 : f32
    %142 = vector.broadcast %cst_44 : f32 to vector<8x128xf32>
    %143 = arith.subf %141, %142 : vector<8x128xf32>
    %144 = arith.select %24, %143, %139 : vector<8x128xi1>, vector<8x128xf32>
    %145 = vector.extract_strided_slice %144 {offsets = [0, 0], sizes = [8, 32], strides = [1, 1]} : vector<8x128xf32> to vector<8x32xf32>
    %146 = vector.extract_strided_slice %144 {offsets = [0, 32], sizes = [8, 32], strides = [1, 1]} : vector<8x128xf32> to vector<8x32xf32>
    %147 = vector.extract_strided_slice %144 {offsets = [0, 64], sizes = [8, 32], strides = [1, 1]} : vector<8x128xf32> to vector<8x32xf32>
    %148 = vector.extract_strided_slice %144 {offsets = [0, 96], sizes = [8, 32], strides = [1, 1]} : vector<8x128xf32> to vector<8x32xf32>
    %149 = arith.mulf %146, %100 : vector<8x32xf32>
    %150 = arith.mulf %145, %147 : vector<8x32xf32>
    %151 = arith.addf %149, %150 : vector<8x32xf32>
    %152 = math.tanh %151 : vector<8x32xf32>
    %153 = arith.mulf %148, %152 : vector<8x32xf32>
    %cst_45 = arith.constant dense<0.000000e+00> : vector<8x128xf32>
    %154 = tpu.matmul %153, %14, %cst_45 {dimension_numbers = #tpu.dot_dimension_numbers<[1], [0], [0], [1], [0, 0, 1, 1], [], []>} : vector<8x32xf32>, vector<32x128xf32>, vector<8x128xf32> -> vector<8x128xf32>
    %155 = arith.addf %154, %129 : vector<8x128xf32>
    %156 = arith.addf %155, %18 : vector<8x128xf32>
    %cst_46 = arith.constant 2.000000e+00 : f32
    %157 = vector.broadcast %cst_46 : f32 to vector<8x128xf32>
    %158 = arith.mulf %156, %157 : vector<8x128xf32>
    %159 = arith.select %24, %158, %156 : vector<8x128xi1>, vector<8x128xf32>
    %160 = arith.negf %159 : vector<8x128xf32>
    %161 = math.exp %160 : vector<8x128xf32>
    %cst_47 = arith.constant 1.000000e+00 : f32
    %162 = vector.broadcast %cst_47 : f32 to vector<8x128xf32>
    %163 = arith.addf %162, %161 : vector<8x128xf32>
    %164 = arith.divf %162, %163 : vector<8x128xf32>
    %cst_48 = arith.constant 2.000000e+00 : f32
    %165 = vector.broadcast %cst_48 : f32 to vector<8x128xf32>
    %166 = arith.mulf %165, %164 : vector<8x128xf32>
    %cst_49 = arith.constant 1.000000e+00 : f32
    %167 = vector.broadcast %cst_49 : f32 to vector<8x128xf32>
    %168 = arith.subf %166, %167 : vector<8x128xf32>
    %169 = arith.select %24, %168, %164 : vector<8x128xi1>, vector<8x128xf32>
    %170 = vector.extract_strided_slice %169 {offsets = [0, 0], sizes = [8, 32], strides = [1, 1]} : vector<8x128xf32> to vector<8x32xf32>
    %171 = vector.extract_strided_slice %169 {offsets = [0, 32], sizes = [8, 32], strides = [1, 1]} : vector<8x128xf32> to vector<8x32xf32>
    %172 = vector.extract_strided_slice %169 {offsets = [0, 64], sizes = [8, 32], strides = [1, 1]} : vector<8x128xf32> to vector<8x32xf32>
    %173 = vector.extract_strided_slice %169 {offsets = [0, 96], sizes = [8, 32], strides = [1, 1]} : vector<8x128xf32> to vector<8x32xf32>
    %174 = arith.mulf %171, %125 : vector<8x32xf32>
    %175 = arith.mulf %170, %172 : vector<8x32xf32>
    %176 = arith.addf %174, %175 : vector<8x32xf32>
    %177 = math.tanh %176 : vector<8x32xf32>
    %178 = arith.mulf %173, %177 : vector<8x32xf32>
    %cst_50 = arith.constant dense<0.000000e+00> : vector<8x128xf32>
    %179 = tpu.matmul %153, %13, %cst_50 {dimension_numbers = #tpu.dot_dimension_numbers<[1], [0], [0], [1], [0, 0, 1, 1], [], []>} : vector<8x32xf32>, vector<32x128xf32>, vector<8x128xf32> -> vector<8x128xf32>
    %cst_51 = arith.constant dense<0.000000e+00> : vector<8x128xf32>
    %180 = tpu.matmul %178, %15, %cst_51 {dimension_numbers = #tpu.dot_dimension_numbers<[1], [0], [0], [1], [0, 0, 1, 1], [], []>} : vector<8x32xf32>, vector<32x128xf32>, vector<8x128xf32> -> vector<8x128xf32>
    %181 = vector.extract_strided_slice %12 {offsets = [24, 0], sizes = [8, 128], strides = [1, 1]} : vector<64x128xf32> to vector<8x128xf32>
    %182 = arith.addf %181, %179 : vector<8x128xf32>
    %cst_52 = arith.constant 2.000000e+00 : f32
    %183 = vector.broadcast %cst_52 : f32 to vector<8x128xf32>
    %184 = arith.mulf %182, %183 : vector<8x128xf32>
    %185 = arith.select %24, %184, %182 : vector<8x128xi1>, vector<8x128xf32>
    %186 = arith.negf %185 : vector<8x128xf32>
    %187 = math.exp %186 : vector<8x128xf32>
    %cst_53 = arith.constant 1.000000e+00 : f32
    %188 = vector.broadcast %cst_53 : f32 to vector<8x128xf32>
    %189 = arith.addf %188, %187 : vector<8x128xf32>
    %190 = arith.divf %188, %189 : vector<8x128xf32>
    %cst_54 = arith.constant 2.000000e+00 : f32
    %191 = vector.broadcast %cst_54 : f32 to vector<8x128xf32>
    %192 = arith.mulf %191, %190 : vector<8x128xf32>
    %cst_55 = arith.constant 1.000000e+00 : f32
    %193 = vector.broadcast %cst_55 : f32 to vector<8x128xf32>
    %194 = arith.subf %192, %193 : vector<8x128xf32>
    %195 = arith.select %24, %194, %190 : vector<8x128xi1>, vector<8x128xf32>
    %196 = vector.extract_strided_slice %195 {offsets = [0, 0], sizes = [8, 32], strides = [1, 1]} : vector<8x128xf32> to vector<8x32xf32>
    %197 = vector.extract_strided_slice %195 {offsets = [0, 32], sizes = [8, 32], strides = [1, 1]} : vector<8x128xf32> to vector<8x32xf32>
    %198 = vector.extract_strided_slice %195 {offsets = [0, 64], sizes = [8, 32], strides = [1, 1]} : vector<8x128xf32> to vector<8x32xf32>
    %199 = vector.extract_strided_slice %195 {offsets = [0, 96], sizes = [8, 32], strides = [1, 1]} : vector<8x128xf32> to vector<8x32xf32>
    %200 = arith.mulf %197, %151 : vector<8x32xf32>
    %201 = arith.mulf %196, %198 : vector<8x32xf32>
    %202 = arith.addf %200, %201 : vector<8x32xf32>
    %203 = math.tanh %202 : vector<8x32xf32>
    %204 = arith.mulf %199, %203 : vector<8x32xf32>
    %cst_56 = arith.constant dense<0.000000e+00> : vector<8x128xf32>
    %205 = tpu.matmul %204, %14, %cst_56 {dimension_numbers = #tpu.dot_dimension_numbers<[1], [0], [0], [1], [0, 0, 1, 1], [], []>} : vector<8x32xf32>, vector<32x128xf32>, vector<8x128xf32> -> vector<8x128xf32>
    %206 = arith.addf %205, %180 : vector<8x128xf32>
    %207 = arith.addf %206, %18 : vector<8x128xf32>
    %cst_57 = arith.constant 2.000000e+00 : f32
    %208 = vector.broadcast %cst_57 : f32 to vector<8x128xf32>
    %209 = arith.mulf %207, %208 : vector<8x128xf32>
    %210 = arith.select %24, %209, %207 : vector<8x128xi1>, vector<8x128xf32>
    %211 = arith.negf %210 : vector<8x128xf32>
    %212 = math.exp %211 : vector<8x128xf32>
    %cst_58 = arith.constant 1.000000e+00 : f32
    %213 = vector.broadcast %cst_58 : f32 to vector<8x128xf32>
    %214 = arith.addf %213, %212 : vector<8x128xf32>
    %215 = arith.divf %213, %214 : vector<8x128xf32>
    %cst_59 = arith.constant 2.000000e+00 : f32
    %216 = vector.broadcast %cst_59 : f32 to vector<8x128xf32>
    %217 = arith.mulf %216, %215 : vector<8x128xf32>
    %cst_60 = arith.constant 1.000000e+00 : f32
    %218 = vector.broadcast %cst_60 : f32 to vector<8x128xf32>
    %219 = arith.subf %217, %218 : vector<8x128xf32>
    %220 = arith.select %24, %219, %215 : vector<8x128xi1>, vector<8x128xf32>
    %221 = vector.extract_strided_slice %220 {offsets = [0, 0], sizes = [8, 32], strides = [1, 1]} : vector<8x128xf32> to vector<8x32xf32>
    %222 = vector.extract_strided_slice %220 {offsets = [0, 32], sizes = [8, 32], strides = [1, 1]} : vector<8x128xf32> to vector<8x32xf32>
    %223 = vector.extract_strided_slice %220 {offsets = [0, 64], sizes = [8, 32], strides = [1, 1]} : vector<8x128xf32> to vector<8x32xf32>
    %224 = vector.extract_strided_slice %220 {offsets = [0, 96], sizes = [8, 32], strides = [1, 1]} : vector<8x128xf32> to vector<8x32xf32>
    %225 = arith.mulf %222, %176 : vector<8x32xf32>
    %226 = arith.mulf %221, %223 : vector<8x32xf32>
    %227 = arith.addf %225, %226 : vector<8x32xf32>
    %228 = math.tanh %227 : vector<8x32xf32>
    %229 = arith.mulf %224, %228 : vector<8x32xf32>
    %cst_61 = arith.constant dense<0.000000e+00> : vector<8x128xf32>
    %230 = tpu.matmul %204, %13, %cst_61 {dimension_numbers = #tpu.dot_dimension_numbers<[1], [0], [0], [1], [0, 0, 1, 1], [], []>} : vector<8x32xf32>, vector<32x128xf32>, vector<8x128xf32> -> vector<8x128xf32>
    %cst_62 = arith.constant dense<0.000000e+00> : vector<8x128xf32>
    %231 = tpu.matmul %229, %15, %cst_62 {dimension_numbers = #tpu.dot_dimension_numbers<[1], [0], [0], [1], [0, 0, 1, 1], [], []>} : vector<8x32xf32>, vector<32x128xf32>, vector<8x128xf32> -> vector<8x128xf32>
    %232 = vector.extract_strided_slice %12 {offsets = [32, 0], sizes = [8, 128], strides = [1, 1]} : vector<64x128xf32> to vector<8x128xf32>
    %233 = arith.addf %232, %230 : vector<8x128xf32>
    %cst_63 = arith.constant 2.000000e+00 : f32
    %234 = vector.broadcast %cst_63 : f32 to vector<8x128xf32>
    %235 = arith.mulf %233, %234 : vector<8x128xf32>
    %236 = arith.select %24, %235, %233 : vector<8x128xi1>, vector<8x128xf32>
    %237 = arith.negf %236 : vector<8x128xf32>
    %238 = math.exp %237 : vector<8x128xf32>
    %cst_64 = arith.constant 1.000000e+00 : f32
    %239 = vector.broadcast %cst_64 : f32 to vector<8x128xf32>
    %240 = arith.addf %239, %238 : vector<8x128xf32>
    %241 = arith.divf %239, %240 : vector<8x128xf32>
    %cst_65 = arith.constant 2.000000e+00 : f32
    %242 = vector.broadcast %cst_65 : f32 to vector<8x128xf32>
    %243 = arith.mulf %242, %241 : vector<8x128xf32>
    %cst_66 = arith.constant 1.000000e+00 : f32
    %244 = vector.broadcast %cst_66 : f32 to vector<8x128xf32>
    %245 = arith.subf %243, %244 : vector<8x128xf32>
    %246 = arith.select %24, %245, %241 : vector<8x128xi1>, vector<8x128xf32>
    %247 = vector.extract_strided_slice %246 {offsets = [0, 0], sizes = [8, 32], strides = [1, 1]} : vector<8x128xf32> to vector<8x32xf32>
    %248 = vector.extract_strided_slice %246 {offsets = [0, 32], sizes = [8, 32], strides = [1, 1]} : vector<8x128xf32> to vector<8x32xf32>
    %249 = vector.extract_strided_slice %246 {offsets = [0, 64], sizes = [8, 32], strides = [1, 1]} : vector<8x128xf32> to vector<8x32xf32>
    %250 = vector.extract_strided_slice %246 {offsets = [0, 96], sizes = [8, 32], strides = [1, 1]} : vector<8x128xf32> to vector<8x32xf32>
    %251 = arith.mulf %248, %202 : vector<8x32xf32>
    %252 = arith.mulf %247, %249 : vector<8x32xf32>
    %253 = arith.addf %251, %252 : vector<8x32xf32>
    %254 = math.tanh %253 : vector<8x32xf32>
    %255 = arith.mulf %250, %254 : vector<8x32xf32>
    %cst_67 = arith.constant dense<0.000000e+00> : vector<8x128xf32>
    %256 = tpu.matmul %255, %14, %cst_67 {dimension_numbers = #tpu.dot_dimension_numbers<[1], [0], [0], [1], [0, 0, 1, 1], [], []>} : vector<8x32xf32>, vector<32x128xf32>, vector<8x128xf32> -> vector<8x128xf32>
    %257 = arith.addf %256, %231 : vector<8x128xf32>
    %258 = arith.addf %257, %18 : vector<8x128xf32>
    %cst_68 = arith.constant 2.000000e+00 : f32
    %259 = vector.broadcast %cst_68 : f32 to vector<8x128xf32>
    %260 = arith.mulf %258, %259 : vector<8x128xf32>
    %261 = arith.select %24, %260, %258 : vector<8x128xi1>, vector<8x128xf32>
    %262 = arith.negf %261 : vector<8x128xf32>
    %263 = math.exp %262 : vector<8x128xf32>
    %cst_69 = arith.constant 1.000000e+00 : f32
    %264 = vector.broadcast %cst_69 : f32 to vector<8x128xf32>
    %265 = arith.addf %264, %263 : vector<8x128xf32>
    %266 = arith.divf %264, %265 : vector<8x128xf32>
    %cst_70 = arith.constant 2.000000e+00 : f32
    %267 = vector.broadcast %cst_70 : f32 to vector<8x128xf32>
    %268 = arith.mulf %267, %266 : vector<8x128xf32>
    %cst_71 = arith.constant 1.000000e+00 : f32
    %269 = vector.broadcast %cst_71 : f32 to vector<8x128xf32>
    %270 = arith.subf %268, %269 : vector<8x128xf32>
    %271 = arith.select %24, %270, %266 : vector<8x128xi1>, vector<8x128xf32>
    %272 = vector.extract_strided_slice %271 {offsets = [0, 0], sizes = [8, 32], strides = [1, 1]} : vector<8x128xf32> to vector<8x32xf32>
    %273 = vector.extract_strided_slice %271 {offsets = [0, 32], sizes = [8, 32], strides = [1, 1]} : vector<8x128xf32> to vector<8x32xf32>
    %274 = vector.extract_strided_slice %271 {offsets = [0, 64], sizes = [8, 32], strides = [1, 1]} : vector<8x128xf32> to vector<8x32xf32>
    %275 = vector.extract_strided_slice %271 {offsets = [0, 96], sizes = [8, 32], strides = [1, 1]} : vector<8x128xf32> to vector<8x32xf32>
    %276 = arith.mulf %273, %227 : vector<8x32xf32>
    %277 = arith.mulf %272, %274 : vector<8x32xf32>
    %278 = arith.addf %276, %277 : vector<8x32xf32>
    %279 = math.tanh %278 : vector<8x32xf32>
    %280 = arith.mulf %275, %279 : vector<8x32xf32>
    %cst_72 = arith.constant dense<0.000000e+00> : vector<8x128xf32>
    %281 = tpu.matmul %255, %13, %cst_72 {dimension_numbers = #tpu.dot_dimension_numbers<[1], [0], [0], [1], [0, 0, 1, 1], [], []>} : vector<8x32xf32>, vector<32x128xf32>, vector<8x128xf32> -> vector<8x128xf32>
    %cst_73 = arith.constant dense<0.000000e+00> : vector<8x128xf32>
    %282 = tpu.matmul %280, %15, %cst_73 {dimension_numbers = #tpu.dot_dimension_numbers<[1], [0], [0], [1], [0, 0, 1, 1], [], []>} : vector<8x32xf32>, vector<32x128xf32>, vector<8x128xf32> -> vector<8x128xf32>
    %283 = vector.extract_strided_slice %12 {offsets = [40, 0], sizes = [8, 128], strides = [1, 1]} : vector<64x128xf32> to vector<8x128xf32>
    %284 = arith.addf %283, %281 : vector<8x128xf32>
    %cst_74 = arith.constant 2.000000e+00 : f32
    %285 = vector.broadcast %cst_74 : f32 to vector<8x128xf32>
    %286 = arith.mulf %284, %285 : vector<8x128xf32>
    %287 = arith.select %24, %286, %284 : vector<8x128xi1>, vector<8x128xf32>
    %288 = arith.negf %287 : vector<8x128xf32>
    %289 = math.exp %288 : vector<8x128xf32>
    %cst_75 = arith.constant 1.000000e+00 : f32
    %290 = vector.broadcast %cst_75 : f32 to vector<8x128xf32>
    %291 = arith.addf %290, %289 : vector<8x128xf32>
    %292 = arith.divf %290, %291 : vector<8x128xf32>
    %cst_76 = arith.constant 2.000000e+00 : f32
    %293 = vector.broadcast %cst_76 : f32 to vector<8x128xf32>
    %294 = arith.mulf %293, %292 : vector<8x128xf32>
    %cst_77 = arith.constant 1.000000e+00 : f32
    %295 = vector.broadcast %cst_77 : f32 to vector<8x128xf32>
    %296 = arith.subf %294, %295 : vector<8x128xf32>
    %297 = arith.select %24, %296, %292 : vector<8x128xi1>, vector<8x128xf32>
    %298 = vector.extract_strided_slice %297 {offsets = [0, 0], sizes = [8, 32], strides = [1, 1]} : vector<8x128xf32> to vector<8x32xf32>
    %299 = vector.extract_strided_slice %297 {offsets = [0, 32], sizes = [8, 32], strides = [1, 1]} : vector<8x128xf32> to vector<8x32xf32>
    %300 = vector.extract_strided_slice %297 {offsets = [0, 64], sizes = [8, 32], strides = [1, 1]} : vector<8x128xf32> to vector<8x32xf32>
    %301 = vector.extract_strided_slice %297 {offsets = [0, 96], sizes = [8, 32], strides = [1, 1]} : vector<8x128xf32> to vector<8x32xf32>
    %302 = arith.mulf %299, %253 : vector<8x32xf32>
    %303 = arith.mulf %298, %300 : vector<8x32xf32>
    %304 = arith.addf %302, %303 : vector<8x32xf32>
    %305 = math.tanh %304 : vector<8x32xf32>
    %306 = arith.mulf %301, %305 : vector<8x32xf32>
    %cst_78 = arith.constant dense<0.000000e+00> : vector<8x128xf32>
    %307 = tpu.matmul %306, %14, %cst_78 {dimension_numbers = #tpu.dot_dimension_numbers<[1], [0], [0], [1], [0, 0, 1, 1], [], []>} : vector<8x32xf32>, vector<32x128xf32>, vector<8x128xf32> -> vector<8x128xf32>
    %308 = arith.addf %307, %282 : vector<8x128xf32>
    %309 = arith.addf %308, %18 : vector<8x128xf32>
    %cst_79 = arith.constant 2.000000e+00 : f32
    %310 = vector.broadcast %cst_79 : f32 to vector<8x128xf32>
    %311 = arith.mulf %309, %310 : vector<8x128xf32>
    %312 = arith.select %24, %311, %309 : vector<8x128xi1>, vector<8x128xf32>
    %313 = arith.negf %312 : vector<8x128xf32>
    %314 = math.exp %313 : vector<8x128xf32>
    %cst_80 = arith.constant 1.000000e+00 : f32
    %315 = vector.broadcast %cst_80 : f32 to vector<8x128xf32>
    %316 = arith.addf %315, %314 : vector<8x128xf32>
    %317 = arith.divf %315, %316 : vector<8x128xf32>
    %cst_81 = arith.constant 2.000000e+00 : f32
    %318 = vector.broadcast %cst_81 : f32 to vector<8x128xf32>
    %319 = arith.mulf %318, %317 : vector<8x128xf32>
    %cst_82 = arith.constant 1.000000e+00 : f32
    %320 = vector.broadcast %cst_82 : f32 to vector<8x128xf32>
    %321 = arith.subf %319, %320 : vector<8x128xf32>
    %322 = arith.select %24, %321, %317 : vector<8x128xi1>, vector<8x128xf32>
    %323 = vector.extract_strided_slice %322 {offsets = [0, 0], sizes = [8, 32], strides = [1, 1]} : vector<8x128xf32> to vector<8x32xf32>
    %324 = vector.extract_strided_slice %322 {offsets = [0, 32], sizes = [8, 32], strides = [1, 1]} : vector<8x128xf32> to vector<8x32xf32>
    %325 = vector.extract_strided_slice %322 {offsets = [0, 64], sizes = [8, 32], strides = [1, 1]} : vector<8x128xf32> to vector<8x32xf32>
    %326 = vector.extract_strided_slice %322 {offsets = [0, 96], sizes = [8, 32], strides = [1, 1]} : vector<8x128xf32> to vector<8x32xf32>
    %327 = arith.mulf %324, %278 : vector<8x32xf32>
    %328 = arith.mulf %323, %325 : vector<8x32xf32>
    %329 = arith.addf %327, %328 : vector<8x32xf32>
    %330 = math.tanh %329 : vector<8x32xf32>
    %331 = arith.mulf %326, %330 : vector<8x32xf32>
    %cst_83 = arith.constant dense<0.000000e+00> : vector<8x128xf32>
    %332 = tpu.matmul %306, %13, %cst_83 {dimension_numbers = #tpu.dot_dimension_numbers<[1], [0], [0], [1], [0, 0, 1, 1], [], []>} : vector<8x32xf32>, vector<32x128xf32>, vector<8x128xf32> -> vector<8x128xf32>
    %cst_84 = arith.constant dense<0.000000e+00> : vector<8x128xf32>
    %333 = tpu.matmul %331, %15, %cst_84 {dimension_numbers = #tpu.dot_dimension_numbers<[1], [0], [0], [1], [0, 0, 1, 1], [], []>} : vector<8x32xf32>, vector<32x128xf32>, vector<8x128xf32> -> vector<8x128xf32>
    %334 = vector.extract_strided_slice %12 {offsets = [48, 0], sizes = [8, 128], strides = [1, 1]} : vector<64x128xf32> to vector<8x128xf32>
    %335 = arith.addf %334, %332 : vector<8x128xf32>
    %cst_85 = arith.constant 2.000000e+00 : f32
    %336 = vector.broadcast %cst_85 : f32 to vector<8x128xf32>
    %337 = arith.mulf %335, %336 : vector<8x128xf32>
    %338 = arith.select %24, %337, %335 : vector<8x128xi1>, vector<8x128xf32>
    %339 = arith.negf %338 : vector<8x128xf32>
    %340 = math.exp %339 : vector<8x128xf32>
    %cst_86 = arith.constant 1.000000e+00 : f32
    %341 = vector.broadcast %cst_86 : f32 to vector<8x128xf32>
    %342 = arith.addf %341, %340 : vector<8x128xf32>
    %343 = arith.divf %341, %342 : vector<8x128xf32>
    %cst_87 = arith.constant 2.000000e+00 : f32
    %344 = vector.broadcast %cst_87 : f32 to vector<8x128xf32>
    %345 = arith.mulf %344, %343 : vector<8x128xf32>
    %cst_88 = arith.constant 1.000000e+00 : f32
    %346 = vector.broadcast %cst_88 : f32 to vector<8x128xf32>
    %347 = arith.subf %345, %346 : vector<8x128xf32>
    %348 = arith.select %24, %347, %343 : vector<8x128xi1>, vector<8x128xf32>
    %349 = vector.extract_strided_slice %348 {offsets = [0, 0], sizes = [8, 32], strides = [1, 1]} : vector<8x128xf32> to vector<8x32xf32>
    %350 = vector.extract_strided_slice %348 {offsets = [0, 32], sizes = [8, 32], strides = [1, 1]} : vector<8x128xf32> to vector<8x32xf32>
    %351 = vector.extract_strided_slice %348 {offsets = [0, 64], sizes = [8, 32], strides = [1, 1]} : vector<8x128xf32> to vector<8x32xf32>
    %352 = vector.extract_strided_slice %348 {offsets = [0, 96], sizes = [8, 32], strides = [1, 1]} : vector<8x128xf32> to vector<8x32xf32>
    %353 = arith.mulf %350, %304 : vector<8x32xf32>
    %354 = arith.mulf %349, %351 : vector<8x32xf32>
    %355 = arith.addf %353, %354 : vector<8x32xf32>
    %356 = math.tanh %355 : vector<8x32xf32>
    %357 = arith.mulf %352, %356 : vector<8x32xf32>
    %cst_89 = arith.constant dense<0.000000e+00> : vector<8x128xf32>
    %358 = tpu.matmul %357, %14, %cst_89 {dimension_numbers = #tpu.dot_dimension_numbers<[1], [0], [0], [1], [0, 0, 1, 1], [], []>} : vector<8x32xf32>, vector<32x128xf32>, vector<8x128xf32> -> vector<8x128xf32>
    %359 = arith.addf %358, %333 : vector<8x128xf32>
    %360 = arith.addf %359, %18 : vector<8x128xf32>
    %cst_90 = arith.constant 2.000000e+00 : f32
    %361 = vector.broadcast %cst_90 : f32 to vector<8x128xf32>
    %362 = arith.mulf %360, %361 : vector<8x128xf32>
    %363 = arith.select %24, %362, %360 : vector<8x128xi1>, vector<8x128xf32>
    %364 = arith.negf %363 : vector<8x128xf32>
    %365 = math.exp %364 : vector<8x128xf32>
    %cst_91 = arith.constant 1.000000e+00 : f32
    %366 = vector.broadcast %cst_91 : f32 to vector<8x128xf32>
    %367 = arith.addf %366, %365 : vector<8x128xf32>
    %368 = arith.divf %366, %367 : vector<8x128xf32>
    %cst_92 = arith.constant 2.000000e+00 : f32
    %369 = vector.broadcast %cst_92 : f32 to vector<8x128xf32>
    %370 = arith.mulf %369, %368 : vector<8x128xf32>
    %cst_93 = arith.constant 1.000000e+00 : f32
    %371 = vector.broadcast %cst_93 : f32 to vector<8x128xf32>
    %372 = arith.subf %370, %371 : vector<8x128xf32>
    %373 = arith.select %24, %372, %368 : vector<8x128xi1>, vector<8x128xf32>
    %374 = vector.extract_strided_slice %373 {offsets = [0, 0], sizes = [8, 32], strides = [1, 1]} : vector<8x128xf32> to vector<8x32xf32>
    %375 = vector.extract_strided_slice %373 {offsets = [0, 32], sizes = [8, 32], strides = [1, 1]} : vector<8x128xf32> to vector<8x32xf32>
    %376 = vector.extract_strided_slice %373 {offsets = [0, 64], sizes = [8, 32], strides = [1, 1]} : vector<8x128xf32> to vector<8x32xf32>
    %377 = vector.extract_strided_slice %373 {offsets = [0, 96], sizes = [8, 32], strides = [1, 1]} : vector<8x128xf32> to vector<8x32xf32>
    %378 = arith.mulf %375, %329 : vector<8x32xf32>
    %379 = arith.mulf %374, %376 : vector<8x32xf32>
    %380 = arith.addf %378, %379 : vector<8x32xf32>
    %381 = math.tanh %380 : vector<8x32xf32>
    %382 = arith.mulf %377, %381 : vector<8x32xf32>
    %cst_94 = arith.constant dense<0.000000e+00> : vector<8x128xf32>
    %383 = tpu.matmul %357, %13, %cst_94 {dimension_numbers = #tpu.dot_dimension_numbers<[1], [0], [0], [1], [0, 0, 1, 1], [], []>} : vector<8x32xf32>, vector<32x128xf32>, vector<8x128xf32> -> vector<8x128xf32>
    %cst_95 = arith.constant dense<0.000000e+00> : vector<8x128xf32>
    %384 = tpu.matmul %382, %15, %cst_95 {dimension_numbers = #tpu.dot_dimension_numbers<[1], [0], [0], [1], [0, 0, 1, 1], [], []>} : vector<8x32xf32>, vector<32x128xf32>, vector<8x128xf32> -> vector<8x128xf32>
    %385 = vector.extract_strided_slice %12 {offsets = [56, 0], sizes = [8, 128], strides = [1, 1]} : vector<64x128xf32> to vector<8x128xf32>
    %386 = arith.addf %385, %383 : vector<8x128xf32>
    %cst_96 = arith.constant 2.000000e+00 : f32
    %387 = vector.broadcast %cst_96 : f32 to vector<8x128xf32>
    %388 = arith.mulf %386, %387 : vector<8x128xf32>
    %389 = arith.select %24, %388, %386 : vector<8x128xi1>, vector<8x128xf32>
    %390 = arith.negf %389 : vector<8x128xf32>
    %391 = math.exp %390 : vector<8x128xf32>
    %cst_97 = arith.constant 1.000000e+00 : f32
    %392 = vector.broadcast %cst_97 : f32 to vector<8x128xf32>
    %393 = arith.addf %392, %391 : vector<8x128xf32>
    %394 = arith.divf %392, %393 : vector<8x128xf32>
    %cst_98 = arith.constant 2.000000e+00 : f32
    %395 = vector.broadcast %cst_98 : f32 to vector<8x128xf32>
    %396 = arith.mulf %395, %394 : vector<8x128xf32>
    %cst_99 = arith.constant 1.000000e+00 : f32
    %397 = vector.broadcast %cst_99 : f32 to vector<8x128xf32>
    %398 = arith.subf %396, %397 : vector<8x128xf32>
    %399 = arith.select %24, %398, %394 : vector<8x128xi1>, vector<8x128xf32>
    %400 = vector.extract_strided_slice %399 {offsets = [0, 0], sizes = [8, 32], strides = [1, 1]} : vector<8x128xf32> to vector<8x32xf32>
    %401 = vector.extract_strided_slice %399 {offsets = [0, 32], sizes = [8, 32], strides = [1, 1]} : vector<8x128xf32> to vector<8x32xf32>
    %402 = vector.extract_strided_slice %399 {offsets = [0, 64], sizes = [8, 32], strides = [1, 1]} : vector<8x128xf32> to vector<8x32xf32>
    %403 = vector.extract_strided_slice %399 {offsets = [0, 96], sizes = [8, 32], strides = [1, 1]} : vector<8x128xf32> to vector<8x32xf32>
    %404 = arith.mulf %401, %355 : vector<8x32xf32>
    %405 = arith.mulf %400, %402 : vector<8x32xf32>
    %406 = arith.addf %404, %405 : vector<8x32xf32>
    %407 = math.tanh %406 : vector<8x32xf32>
    %408 = arith.mulf %403, %407 : vector<8x32xf32>
    %cst_100 = arith.constant dense<0.000000e+00> : vector<8x128xf32>
    %409 = tpu.matmul %408, %14, %cst_100 {dimension_numbers = #tpu.dot_dimension_numbers<[1], [0], [0], [1], [0, 0, 1, 1], [], []>} : vector<8x32xf32>, vector<32x128xf32>, vector<8x128xf32> -> vector<8x128xf32>
    %410 = arith.addf %409, %384 : vector<8x128xf32>
    %411 = arith.addf %410, %18 : vector<8x128xf32>
    %cst_101 = arith.constant 2.000000e+00 : f32
    %412 = vector.broadcast %cst_101 : f32 to vector<8x128xf32>
    %413 = arith.mulf %411, %412 : vector<8x128xf32>
    %414 = arith.select %24, %413, %411 : vector<8x128xi1>, vector<8x128xf32>
    %415 = arith.negf %414 : vector<8x128xf32>
    %416 = math.exp %415 : vector<8x128xf32>
    %cst_102 = arith.constant 1.000000e+00 : f32
    %417 = vector.broadcast %cst_102 : f32 to vector<8x128xf32>
    %418 = arith.addf %417, %416 : vector<8x128xf32>
    %419 = arith.divf %417, %418 : vector<8x128xf32>
    %cst_103 = arith.constant 2.000000e+00 : f32
    %420 = vector.broadcast %cst_103 : f32 to vector<8x128xf32>
    %421 = arith.mulf %420, %419 : vector<8x128xf32>
    %cst_104 = arith.constant 1.000000e+00 : f32
    %422 = vector.broadcast %cst_104 : f32 to vector<8x128xf32>
    %423 = arith.subf %421, %422 : vector<8x128xf32>
    %424 = arith.select %24, %423, %419 : vector<8x128xi1>, vector<8x128xf32>
    %425 = vector.extract_strided_slice %424 {offsets = [0, 0], sizes = [8, 32], strides = [1, 1]} : vector<8x128xf32> to vector<8x32xf32>
    %426 = vector.extract_strided_slice %424 {offsets = [0, 32], sizes = [8, 32], strides = [1, 1]} : vector<8x128xf32> to vector<8x32xf32>
    %427 = vector.extract_strided_slice %424 {offsets = [0, 64], sizes = [8, 32], strides = [1, 1]} : vector<8x128xf32> to vector<8x32xf32>
    %428 = vector.extract_strided_slice %424 {offsets = [0, 96], sizes = [8, 32], strides = [1, 1]} : vector<8x128xf32> to vector<8x32xf32>
    %429 = arith.mulf %426, %380 : vector<8x32xf32>
    %430 = arith.mulf %425, %427 : vector<8x32xf32>
    %431 = arith.addf %429, %430 : vector<8x32xf32>
    %432 = math.tanh %431 : vector<8x32xf32>
    %433 = arith.mulf %428, %432 : vector<8x32xf32>
    %c0_105 = arith.constant 0 : index
    %c0_106 = arith.constant 0 : index
    %434 = vector.load %arg8[%c0_105, %c0_106] : memref<1x32xf32, #tpu.memory_space<vmem>>, vector<1x32xf32>
    %435 = vector.broadcast %434 : vector<1x32xf32> to vector<8x32xf32>
    %436 = arith.mulf %433, %435 : vector<8x32xf32>
    %cst_107 = arith.constant dense<0.000000e+00> : vector<8xf32>
    %437 = vector.multi_reduction <add>, %436, %cst_107 [1] : vector<8x32xf32> to vector<8xf32>
    %438 = vector.shape_cast %437 : vector<8xf32> to vector<8x1xf32>
    %c0_108 = arith.constant 0 : index
    %c0_109 = arith.constant 0 : index
    %439 = vector.load %arg9[%c0_108, %c0_109] : memref<1x1xf32, #tpu.memory_space<vmem>>, vector<1x1xf32>
    %440 = vector.broadcast %439 : vector<1x1xf32> to vector<8x1xf32>
    %441 = arith.addf %438, %440 : vector<8x1xf32>
    %442 = arith.negf %441 : vector<8x1xf32>
    %443 = math.exp %442 : vector<8x1xf32>
    %cst_110 = arith.constant 1.000000e+00 : f32
    %444 = vector.broadcast %cst_110 : f32 to vector<8x1xf32>
    %445 = arith.addf %444, %443 : vector<8x1xf32>
    %446 = arith.divf %444, %445 : vector<8x1xf32>
    %447 = vector.shape_cast %446 : vector<8x1xf32> to vector<8x1xf32>
    %448 = vector.broadcast %447 : vector<8x1xf32> to vector<8x128xf32>
    %c0_111 = arith.constant 0 : index
    %c0_112 = arith.constant 0 : index
    %449 = vector.load %arg10[%c0_111, %c0_112] : memref<8x128xf32, #tpu.memory_space<vmem>>, vector<8x128xf32>
    tpu.vector_store %arg10[%c0_111, %c0_112], %448 {strides = array<i32>} : memref<8x128xf32, #tpu.memory_space<vmem>>, vector<8x128xf32>,
    return
  }
}

</mosaic_0001>

<bundles_post_ra>
// kernel: tpu_custom_call.1
= control target key start
LH: loop header
LB: loop body
LE: loop exit
PB: predicated region body
PF: predicated region fallthrough
CT: control target
= control target key end

     0   :  { %s4149_s0 = inlined_call_operand.vmem [shape: s32[64,1], index: 0, kind: input, shape index: {}]   ;;  %s4150_s1 = inlined_call_operand.vmem [shape: f32[128,16], index: 1, kind: input, shape index: {}]   ;;  %s4151_s2 = inlined_call_operand.vmem [shape: f32[16,128], index: 2, kind: input, shape index: {}]   ;;  %s4152_s3 = inlined_call_operand.vmem [shape: f32[32,128], index: 3, kind: input, shape index: {}]   ;;  %s4153_s4 = inlined_call_operand.vmem [shape: f32[1,128], index: 4, kind: input, shape index: {}]   ;;  %s4154_s5 = inlined_call_operand.vmem [shape: f32[32,128], index: 5, kind: input, shape index: {}]   ;;  %s4155_s6 = inlined_call_operand.vmem [shape: f32[32,128], index: 6, kind: input, shape index: {}]   ;;  %s4156_s7 = inlined_call_operand.vmem [shape: f32[1,128], index: 7, kind: input, shape index: {}]   ;;  %s4157_s8 = inlined_call_operand.vmem [shape: f32[1,32], index: 8, kind: input, shape index: {}]   ;;  %s4158_s9 = inlined_call_operand.<no memory space> [shape: f32[1,1], index: 9, kind: input, shape index: {}]   ;;  %s4159_s10 = inlined_call_operand.hbm [shape: f32[8,128], index: 10, kind: output, shape index: {}]  }
   0x1   :  { %v15_v0 = vstv %s4158_s9 }
   0x2   :  { %16 = vst [vmem:[#allocation2] sm:$0x1] %v15_v0 }
   0x3   :  { %v40_v1 = vld [vmem:[%s4149_s0 + $0x10] sm:$0xff]  ;;  %v38_v2 = vld [vmem:[%s4149_s0] sm:$0xff]  ;;  %v3529_v3 = vmov 0   ;;  %v41_v4 = vld [vmem:[%s4149_s0 + $0x18] sm:$0xff] }
   0x4   :  { %3403 = vset.pattern.permute.xlu1 %v3529_v3  ;;  %3402 = vset.pattern.permute.xlu0 %v3529_v3  ;;  %v39_v5 = vld [vmem:[%s4149_s0 + $0x8] sm:$0xff]  ;;  %v96_v6 = vld [vmem:[%s4150_s1] sm:$0xff]  ;;  %v98_v8 = vld [vmem:[%s4150_s1 + $0x10] sm:$0xff] }
   0x5   :  { %55 = vperm.xlu1 %3403, %v40_v1   ;;  %49 = vperm.xlu0 %3402, %v38_v2   ;;  %v97_v7 = vld [vmem:[%s4150_s1 + $0x8] sm:$0xff]  ;;  %v99_v9 = vld [vmem:[%s4150_s1 + $0x18] sm:$0xff]  ;;  %v100_v12 = vld [vmem:[%s4150_s1 + $0x20] sm:$0xff] }
   0x6   :  { %v3213_v10 = vpack.c.bf16 %v97_v7, %v96_v6  ;;  %v3217_v11 = vpack.c.bf16 %v99_v9, %v98_v8  ;;  %v101_v13 = vld [vmem:[%s4150_s1 + $0x28] sm:$0xff]  ;;  %v42_v15 = vld [vmem:[%s4149_s0 + $0x20] sm:$0xff] }
   0x7   :  { %v43_v14 = vld [vmem:[%s4149_s0 + $0x28] sm:$0xff] }
   0x8   :  { %3214 = vmatprep.subr.bf16.mxu0 %v3213_v10 }
   0x9   :  { %58 = vperm.xlu1 %3403, %v41_v4   ;;  %52 = vperm.xlu0 %3402, %v39_v5  }
   0xa   :  { %3216 = vmatpush3.bf16.msra.mxu0 %v3213_v10 }
   0xb   :  { %17 = vsyncpa [#allocation4], 0  ;;  %3218 = vmatprep.subr.bf16.mxu0 %v3217_v11  ;;  %v3221_v16 = vpack.c.bf16 %v101_v13, %v100_v12  ;;  %v102_v17 = vld [vmem:[%s4150_s1 + $0x30] sm:$0xff]  ;;  %v103_v18 = vld [vmem:[%s4150_s1 + $0x38] sm:$0xff]  ;;  %v46_v37 = vlaneseq  ;;  %v3530_v41 = vmov 1.0   ;;  %v3531_v48 = vmov 0.0|0.0  }
   0xc   :  { %v45_v19 = vld [vmem:[%s4149_s0 + $0x38] sm:$0xff]  ;;  %v44_v20 = vld [vmem:[%s4149_s0 + $0x30] sm:$0xff]  ;;  %v3225_v21 = vpack.c.bf16 %v103_v18, %v102_v17  ;;  %v104_v22 = vld [vmem:[%s4150_s1 + $0x40] sm:$0xff]  ;;  %vm3532_vm8 = vmmov 0   ;;  %v3533_v49 = vmov 0.0   ;;  %vm226_vm9 = vcmask 130048  }
   0xd   :  { %64 = vperm.xlu1 %3403, %v43_v14   ;;  %61 = vperm.xlu0 %3402, %v42_v15   ;;  %v105_v23 = vld [vmem:[%s4150_s1 + $0x48] sm:$0xff]  ;;  %v106_v25 = vld [vmem:[%s4150_s1 + $0x50] sm:$0xff]  ;;  %v107_v26 = vld [vmem:[%s4150_s1 + $0x58] sm:$0xff]  ;;  %v3674_v38 = vand.u32 127, %v46_v37  ;;  %s3535_s30 = smov 32   ;;  %vm378_vm13 = vcmask 261120  }
   0xe   :  { %3220 = vmatpush3.bf16.msra.mxu0 %v3217_v11  ;;  %v3229_v24 = vpack.c.bf16 %v105_v23, %v104_v22  ;;  %v217_v27 = vld [vmem:[%s4151_s2] sm:$0xff]  ;;  %v218_v28 = vld [vmem:[%s4151_s2 + $0x8] sm:$0xff]  ;;  %v3233_v30 = vpack.c.bf16 %v107_v26, %v106_v25  ;;  %v110_v34 = vld [vmem:[%s4150_s1 + $0x70] sm:$0xff]  ;;  %s3536_s26 = smov 96  }
   0xf   :  { %3222 = vmatprep.subr.bf16.mxu0 %v3221_v16  ;;  %v3245_v29 = vpack.c.bf16 %v218_v28, %v217_v27  ;;  %v108_v31 = vld [vmem:[%s4150_s1 + $0x60] sm:$0xff]  ;;  %v109_v32 = vld [vmem:[%s4150_s1 + $0x68] sm:$0xff]  ;;  %v111_v35 = vld [vmem:[%s4150_s1 + $0x78] sm:$0xff]  ;;  %vm375_vm10 = vcmp.ge.s32.totalorder %v3674_v38, 64  ;;  %vm376_vm11 = vcmp.lt.s32.totalorder %v3674_v38, 96 }
  0x10   :  { %v3237_v33 = vpack.c.bf16 %v109_v32, %v108_v31  ;;  %v3241_v36 = vpack.c.bf16 %v111_v35, %v110_v34  ;;  %v356_v50 = vld [vmem:[%s4152_s3] sm:$0xff]  ;;  %v357_v51 = vld [vmem:[%s4152_s3 + $0x8] sm:$0xff]  ;;  %v358_v55 = vld [vmem:[%s4152_s3 + $0x10] sm:$0xff] }
  0x11   :  { %70 = vperm.xlu1 %3403, %v45_v19   ;;  %67 = vperm.xlu0 %3402, %v44_v20   ;;  %v3694_v53 = vpack.c.bf16 %v357_v51, %v356_v50  ;;  %v359_v56 = vld [vmem:[%s4152_s3 + $0x18] sm:$0xff]  ;;  %v2668_v0 = vld [vmem:[%s4153_s4] ss:$0 sm:$0xff]  ;;  %vm3740_vm12 = vmand %vm375_vm10, %vm376_vm11  ;;  %s3534_s4 = smov 64  }
  0x12   :  { %3224 = vmatpush3.bf16.msra.mxu0 %v3221_v16  ;;  %3246 = vmatprep.subr.bf16.mxu1 %v3245_v29  ;;  %v3705_v58 = vpack.c.bf16 %v359_v56, %v358_v55  ;;  %v364_v35 = vld [vmem:[%s4155_s6] sm:$0xff]  ;;  %v366_v37 = vld [vmem:[%s4155_s6 + $0x10] sm:$0xff] }
  0x13   :  { %3226 = vmatprep.subr.bf16.mxu0 %v3225_v21  ;;  %3248 = vmatpush3.bf16.msra.mxu1 %v3245_v29  ;;  %v3819_v56 = vld [vmem:[%s4156_s7] ss:$0 sm:$0xff] }
  0x14   :  { %3249 = vmatprep.subr.bf16.mxu1 %v3531_v48 }
  0x16   :  { %3228 = vmatpush3.bf16.msra.mxu0 %v3225_v21 }
  0x17   :  { %3230 = vmatprep.subr.bf16.mxu0 %v3229_v24 }
  0x1a   :  { %3232 = vmatpush3.bf16.msra.mxu0 %v3229_v24 }
  0x1b   :  { %3234 = vmatprep.subr.bf16.mxu0 %v3233_v30 }
  0x1e   :  { %3236 = vmatpush3.bf16.msra.mxu0 %v3233_v30 }
  0x1f   :  { %3238 = vmatprep.subr.bf16.mxu0 %v3237_v33 }
  0x22   :  { %3240 = vmatpush3.bf16.msra.mxu0 %v3237_v33 }
  0x23   :  { %3242 = vmatprep.subr.bf16.mxu0 %v3241_v36 }
  0x26   :  { %3244 = vmatpush3.bf16.msra.mxu0 %v3241_v36  ;;  %v365_v36 = vld [vmem:[%s4155_s6 + $0x8] sm:$0xff] }
  0x27   :  { %3273 = vmatprep.subr.bf16.mxu0 %v3531_v48 }
  0x84   :  { %v56_v39 = vpop.permute.xlu1 %55  ;;  %v50_v40 = vpop.permute.xlu0 %49 }
  0x85   :  { %vm72_vm0 = vcmp.eq.s32.totalorder %v3674_v38, %v50_v40  ;;  %vm74_vm1 = vcmp.eq.s32.totalorder %v3674_v38, %v56_v39  ;;  %v367_v39 = vld [vmem:[%s4155_s6 + $0x18] sm:$0xff] }
  0x86   :  { %2921 = vmatprep.mubr.msk.f32.mxu0 %vm72_vm0, %v3530_v41  ;;  %v3768_v40 = vpack.c.bf16 %v367_v39, %v366_v37 }
  0x88   :  { %v59_v42 = vpop.permute.xlu1 %58  ;;  %v53_v43 = vpop.permute.xlu0 %52 }
  0x89   :  { %vm73_vm2 = vcmp.eq.s32.totalorder %v3674_v38, %v53_v43  ;;  %vm75_vm3 = vcmp.eq.s32.totalorder %v3674_v38, %v59_v42  ;;  %v361_v42 = vld [vmem:[%s4154_s5 + $0x8] sm:$0xff] }
  0x8a   :  { %2922 = vmatmul.mubr.msk.f32.vlgmr.msra.gmra.mrb[0].mxu0 %vm73_vm2, %v3530_v41 }
  0x8b   :  { %2924 = vmatprep.mubr.msk.f32.mxu0 %vm74_vm1, %v3530_v41 }
  0x8c   :  { %v65_v44 = vpop.permute.xlu1 %64  ;;  %v62_v45 = vpop.permute.xlu0 %61 }
  0x8d   :  { %vm76_vm4 = vcmp.eq.s32.totalorder %v3674_v38, %v62_v45  ;;  %vm77_vm5 = vcmp.eq.s32.totalorder %v3674_v38, %v65_v44  ;;  %v362_v44 = vld [vmem:[%s4154_s5 + $0x10] sm:$0xff]  ;;  %v363_v45 = vld [vmem:[%s4154_s5 + $0x18] sm:$0xff] }
  0x8e   :  { %2925 = vmatmul.mubr.msk.f32.gmra.mrb[2].mxu0 %vm75_vm3, %v3530_v41 }
  0x8f   :  { %2927 = vmatprep.mubr.msk.f32.mxu0 %vm76_vm4, %v3530_v41 }
  0x90   :  { %v68_v46 = vpop.permute.xlu0 %67  ;;  %v71_v47 = vpop.permute.xlu1 %70 }
  0x91   :  { %vm78_vm6 = vcmp.eq.s32.totalorder %v3674_v38, %v68_v46  ;;  %vm79_vm7 = vcmp.eq.s32.totalorder %v3674_v38, %v71_v47  ;;  %v3762_v38 = vpack.c.bf16 %v365_v36, %v364_v35  ;;  %v3794_v47 = vpack.c.bf16 %v363_v45, %v362_v44 }
  0x92   :  { %2928 = vmatmul.mubr.msk.f32.gmra.mrb[4].mxu0 %vm77_vm5, %v3530_v41 }
  0x93   :  { %2930 = vmatprep.mubr.msk.f32.mxu0 %vm78_vm6, %v3530_v41  ;;  %3275 = vmatpush3.bf16.msra.mxu0 %v3762_v38 }
  0x94   :  { %3276 = vmatprep.subr.bf16.mxu0 %v3531_v48 }
  0x96   :  { %2931 = vmatmul.mubr.msk.f32.gmra.mrb[6].mxu0 %vm79_vm7, %v3530_v41  ;;  %v360_v41 = vld [vmem:[%s4154_s5] sm:$0xff] }
  0x97   :  { %3001 = vmatprep.mubr.msk.f32.mxu0 %vm3532_vm8, %v3533_v49  ;;  %v3780_v43 = vpack.c.bf16 %v361_v42, %v360_v41  ;;  %3278 = vmatpush3.bf16.msra.mxu0 %v3768_v40 }
  0x98   :  { %3285 = vmatprep.subr.bf16.mxu0 %v3531_v48 }
 0x15d   :  { %v2923_v52 = vpop.f32.mrb[0].mxu0 }
 0x15e   :  { %v178_v54 = vpop.f32.mrb[1].mxu0 }
 0x15f   :  { %2937 = vmatprep.mubr.msk.f32.mxu1 %vm226_vm9, %v178_v54 }
 0x160   :  { %2938 = vmatmul.mubr.msk.f32.vlgmr.msra.gmra.mrb[0].mxu1 %vm226_vm9, %v2923_v52 }
 0x161   :  { %3251 = vmatpush3.bf16.msra.mxu1 %v3694_v53  ;;  %v2926_v57 = vpop.f32.mrb[2].mxu0 }
 0x162   :  { %v188_v59 = vpop.f32.mrb[3].mxu0  ;;  %3252 = vmatprep.subr.bf16.mxu1 %v3531_v48 }
 0x163   :  { %2940 = vmatprep.mubr.msk.f32.mxu1 %vm226_vm9, %v188_v59 }
 0x164   :  { %2941 = vmatmul.mubr.msk.f32.gmra.mrb[2].mxu1 %vm226_vm9, %v2926_v57 }
 0x165   :  { %v2929_v60 = vpop.f32.mrb[4].mxu0  ;;  %3254 = vmatpush3.bf16.msra.mxu1 %v3705_v58 }
 0x166   :  { %v198_v61 = vpop.f32.mrb[5].mxu0  ;;  %3255 = vmatprep.subr.bf16.mxu1 %v3531_v48 }
 0x167   :  { %2943 = vmatprep.mubr.msk.f32.mxu1 %vm226_vm9, %v198_v61 }
 0x168   :  { %2944 = vmatmul.mubr.msk.f32.gmra.mrb[4].mxu1 %vm226_vm9, %v2929_v60 }
 0x169   :  { %v2932_v62 = vpop.f32.mrb[6].mxu0 }
 0x16a   :  { %v208_v63 = vpop.f32.mrb[7].mxu0 }
 0x16b   :  { %2946 = vmatprep.mubr.msk.f32.mxu1 %vm226_vm9, %v208_v63 }
 0x16c   :  { %2947 = vmatmul.mubr.msk.f32.gmra.mrb[6].mxu1 %vm226_vm9, %v2932_v62 }
 0x16d   :  { %2957 = vmatprep.mubr.msk.f32.mxu1 %vm3532_vm8, %v3533_v49 }
 0x170   :  { %2958 = vmatmul.mubr.f32.vlgmr.msra.gmra.mrb[8].mxu1 %v3533_v49 }
 0x171   :  { %2968 = vmatprep.mubr.msk.f32.mxu1 %vm3532_vm8, %v3533_v49  ;;  %3257 = vmatpush3.bf16.msra.mxu1 %v3762_v38 }
 0x172   :  { %3258 = vmatprep.subr.bf16.mxu1 %v3531_v48 }
 0x175   :  { %3260 = vmatpush3.bf16.msra.mxu1 %v3768_v40 }
 0x176   :  { %3261 = vmatprep.subr.bf16.mxu1 %v3531_v48 }
 0x178   :  { %2969 = vmatmul.mubr.f32.vlgmr.msra.gmra.mrb[10].mxu1 %v3533_v49 }
 0x179   :  { %3263 = vmatpush3.bf16.msra.mxu1 %v3780_v43  ;;  %2979 = vmatprep.mubr.msk.f32.mxu1 %vm3532_vm8, %v3533_v49 }
 0x17a   :  { %3264 = vmatprep.subr.bf16.mxu1 %v3531_v48 }
 0x17d   :  { %3266 = vmatpush3.bf16.msra.mxu1 %v3794_v47 }
 0x17e   :  { %3267 = vmatprep.subr.bf16.mxu1 %v3531_v48 }
 0x233   :  { %v2939_v1 = vpop.f32.mrb[0].mxu1 }
 0x234   :  { %v3724_v2 = vadd.f32 %v2939_v1, %v2668_v0  ;;  %v317_v3 = vpop.f32.mrb[1].mxu1 }
 0x235   :  { %v318_v16 = vadd.f32 %v2668_v0, %v317_v3 }
 0x237   :  { %v2942_v4 = vpop.f32.mrb[2].mxu1 }
 0x238   :  { %v3726_v5 = vadd.f32 %v2942_v4, %v2668_v0  ;;  %v327_v6 = vpop.f32.mrb[3].mxu1 }
 0x239   :  { %v3728_v7 = vadd.f32 %v2668_v0, %v327_v6 }
 0x23b   :  { %v2945_v8 = vpop.f32.mrb[4].mxu1 }
 0x23c   :  { %v3730_v9 = vadd.f32 %v2945_v8, %v2668_v0  ;;  %v337_v10 = vpop.f32.mrb[5].mxu1 }
 0x23d   :  { %v3732_v11 = vadd.f32 %v2668_v0, %v337_v10 }
 0x23f   :  { %v2948_v12 = vpop.f32.mrb[6].mxu1 }
 0x240   :  { %v3734_v13 = vadd.f32 %v2948_v12, %v2668_v0  ;;  %v347_v14 = vpop.f32.mrb[7].mxu1 }
 0x241   :  { %v3736_v15 = vadd.f32 %v2668_v0, %v347_v14 }
 0x243   :  { %v448_v17 = vpop.f32.mrb[8].mxu1 }
 0x244   :  { %v522_v18 = vadd.f32 %v448_v17, %v318_v16  ;;  %v2959_v19 = vpop.f32.mrb[9].mxu1 }
 0x246   :  { %v523_v21 = vmul.f32 2.0, %v522_v18 }
 0x248   :  { %v524_v22 = vsel %vm3740_vm12, %v523_v21, %v522_v18 }
 0x249   :  { %v2678_v23 = vmul.f32 -1.442695, %v524_v22 }
 0x24b   :  { %3404 = vpow2.f32 %v2678_v23  ;;  %v518_v52 = vpop.f32.mrb[10].mxu1 }
 0x24c   :  { %v2970_v54 = vpop.f32.mrb[11].mxu1 }
 0x255   :  { %v3405_v24 = vpop.eup %3404 }
 0x256   :  { %v528_v25 = vadd.f32 1.0, %v3405_v24 }
 0x258   :  { %3406 = vrcp.f32 %v528_v25 }
 0x262   :  { %v3407_v26 = vpop.eup %3406 }
 0x263   :  { %v531_v27 = vmul.f32 2.0, %v3407_v26 }
 0x265   :  { %v2679_v28 = vadd.f32 -1.0, %v531_v27 }
 0x267   :  { %v533_v29 = vsel %vm3740_vm12, %v2679_v28, %v3407_v26 }
 0x268   :  { %536 = vrot.lane.b32.xlu0 %v533_v29, %s3534_s4  ;;  %v534_v32 = vmul.f32 0.0, %v533_v29 }
 0x2da   :  { %v537_v30 = vpop.permute.xlu0 %536 }
 0x2db   :  { %v539_v31 = vmul.f32 %v537_v30, %v533_v29 }
 0x2dd   :  { %541 = vrot.lane.b32.xlu1 %v539_v31, %s3535_s30 }
 0x34f   :  { %v542_v33 = vpop.permute.xlu1 %541 }
 0x350   :  { %v3750_v34 = vadd.f32 %v542_v33, %v534_v32 }
 0x352   :  { %3408 = vtanh.f32 %v3750_v34 }
 0x35c   :  { %v3409_v46 = vpop.eup %3408 }
 0x35d   :  { %547 = vrot.lane.b32.xlu0 %v3409_v46, %s3534_s4 }
 0x3cf   :  { %v548_v50 = vpop.permute.xlu0 %547 }
 0x3d0   :  { %v550_v51 = vmul.f32 %v548_v50, %v533_v29 }
 0x3d2   :  { %552 = vrot.lane.b32.xlu1 %v550_v51, %s3535_s30 }
 0x444   :  { %v553_v55 = vpop.permute.xlu1 %552 }
 0x445   :  { %2980 = vmatmul.mubr.msk.f32.vlgmr.msra.gmra.mrb[12].mxu1 %vm378_vm13, %v553_v55 }
 0x446   :  { %3269 = vmatpush3.bf16.msra.mxu1 %v3694_v53  ;;  %2990 = vmatprep.mubr.msk.f32.mxu1 %vm3532_vm8, %v3533_v49 }
 0x447   :  { %3270 = vmatprep.subr.bf16.mxu1 %v3531_v48 }
 0x44a   :  { %3272 = vmatpush3.bf16.msra.mxu1 %v3705_v58 }
 0x44b   :  { %3279 = vmatprep.subr.bf16.mxu1 %v3531_v48 }
 0x44d   :  { %2991 = vmatmul.mubr.msk.f32.vlgmr.msra.gmra.mrb[14].mxu1 %vm378_vm13, %v553_v55 }
 0x44e   :  { %3281 = vmatpush3.bf16.msra.mxu1 %v3780_v43  ;;  %3012 = vmatprep.mubr.msk.f32.mxu1 %vm3532_vm8, %v3533_v49 }
 0x44f   :  { %3282 = vmatprep.subr.bf16.mxu1 %v3531_v48 }
 0x452   :  { %3284 = vmatpush3.bf16.msra.mxu1 %v3794_v47 }
 0x453   :  { %3291 = vmatprep.subr.bf16.mxu1 %v3531_v48 }
 0x518   :  { %v622_v57 = vpop.f32.mrb[12].mxu1 }
 0x519   :  { %v623_v59 = vadd.f32 %v622_v57, %v518_v52  ;;  %v2981_v60 = vpop.f32.mrb[13].mxu1 }
 0x51b   :  { %v626_v61 = vadd.f32 %v3819_v56, %v623_v59 }
 0x51d   :  { %v627_v62 = vmul.f32 2.0, %v626_v61 }
 0x51f   :  { %v628_v63 = vsel %vm3740_vm12, %v627_v62, %v626_v61 }
 0x520   :  { %v2681_v0 = vmul.f32 -1.442695, %v628_v63  ;;  %v721_v1 = vpop.f32.mrb[14].mxu1 }
 0x521   :  { %v800_v3 = vadd.f32 %v721_v1, %v3724_v2  ;;  %v2992_v4 = vpop.f32.mrb[15].mxu1 }
 0x522   :  { %3410 = vpow2.f32 %v2681_v0 }
 0x523   :  { %v801_v6 = vmul.f32 2.0, %v800_v3 }
 0x525   :  { %v802_v8 = vsel %vm3740_vm12, %v801_v6, %v800_v3 }
 0x526   :  { %v2685_v10 = vmul.f32 -1.442695, %v802_v8 }
 0x528   :  { %3412 = vpow2.f32 %v2685_v10 }
 0x52c   :  { %v3411_v12 = vpop.eup %3410 }
 0x52d   :  { %v632_v14 = vadd.f32 1.0, %v3411_v12 }
 0x52f   :  { %3414 = vrcp.f32 %v632_v14 }
 0x532   :  { %v3413_v16 = vpop.eup %3412 }
 0x533   :  { %v806_v17 = vadd.f32 1.0, %v3413_v16 }
 0x535   :  { %3416 = vrcp.f32 %v806_v17 }
 0x539   :  { %v3415_v18 = vpop.eup %3414 }
 0x53a   :  { %v635_v19 = vmul.f32 2.0, %v3415_v18 }
 0x53c   :  { %v2682_v21 = vadd.f32 -1.0, %v635_v19 }
 0x53e   :  { %v637_v2 = vsel %vm3740_vm12, %v2682_v21, %v3415_v18 }
 0x53f   :  { %v3417_v22 = vpop.eup %3416  ;;  %640 = vrot.lane.b32.xlu0 %v637_v2, %s3534_s4  ;;  %v638_v30 = vmul.f32 0.0, %v637_v2 }
 0x540   :  { %v809_v23 = vmul.f32 2.0, %v3417_v22 }
 0x542   :  { %v2686_v24 = vadd.f32 -1.0, %v809_v23 }
 0x544   :  { %v811_v25 = vsel %vm3740_vm12, %v2686_v24, %v3417_v22 }
 0x545   :  { %814 = vrot.lane.b32.xlu1 %v811_v25, %s3534_s4  ;;  %v812_v33 = vmul.f32 %v811_v25, %v3750_v34 }
 0x5b1   :  { %v641_v26 = vpop.permute.xlu0 %640 }
 0x5b2   :  { %v643_v27 = vmul.f32 %v641_v26, %v637_v2 }
 0x5b4   :  { %645 = vrot.lane.b32.xlu0 %v643_v27, %s3535_s30 }
 0x5b7   :  { %v815_v28 = vpop.permute.xlu1 %814 }
 0x5b8   :  { %v817_v29 = vmul.f32 %v815_v28, %v811_v25 }
 0x5ba   :  { %819 = vrot.lane.b32.xlu1 %v817_v29, %s3535_s30 }
 0x626   :  { %v646_v31 = vpop.permute.xlu0 %645 }
 0x627   :  { %v3835_v32 = vadd.f32 %v646_v31, %v638_v30 }
 0x629   :  { %3418 = vtanh.f32 %v3835_v32 }
 0x62c   :  { %v820_v35 = vpop.permute.xlu1 %819 }
 0x62d   :  { %v3839_v36 = vadd.f32 %v820_v35, %v812_v33 }
 0x62f   :  { %3420 = vtanh.f32 %v3839_v36 }
 0x633   :  { %v3419_v37 = vpop.eup %3418 }
 0x634   :  { %651 = vrot.lane.b32.xlu0 %v3419_v37, %s3534_s4 }
 0x639   :  { %v3421_v39 = vpop.eup %3420 }
 0x63a   :  { %825 = vrot.lane.b32.xlu1 %v3421_v39, %s3534_s4 }
 0x6a6   :  { %v652_v41 = vpop.permute.xlu0 %651 }
 0x6a7   :  { %v654_v42 = vmul.f32 %v652_v41, %v637_v2 }
 0x6a9   :  { %726 = vrot.lane.b32.xlu0 %v654_v42, %s3535_s30 }
 0x6ac   :  { %v826_v44 = vpop.permute.xlu1 %825 }
 0x6ad   :  { %v828_v45 = vmul.f32 %v826_v44, %v811_v25 }
 0x6af   :  { %830 = vrot.lane.b32.xlu1 %v828_v45, %s3535_s30 }
 0x71b   :  { %v727_v34 = vpop.permute.xlu0 %726 }
 0x71c   :  { %3002 = vmatmul.mubr.msk.f32.vlgmr.msra.gmra.mrb[8].mxu0 %vm378_vm13, %v727_v34 }
 0x71d   :  { %3287 = vmatpush3.bf16.msra.mxu0 %v3694_v53  ;;  %3023 = vmatprep.mubr.msk.f32.mxu0 %vm3532_vm8, %v3533_v49 }
 0x71e   :  { %3288 = vmatprep.subr.bf16.mxu0 %v3531_v48 }
 0x721   :  { %3290 = vmatpush3.bf16.msra.mxu0 %v3705_v58  ;;  %v831_v46 = vpop.permute.xlu1 %830 }
 0x722   :  { %3013 = vmatmul.mubr.msk.f32.vlgmr.msra.gmra.mrb[16].mxu1 %vm378_vm13, %v831_v46  ;;  %3297 = vmatprep.subr.bf16.mxu0 %v3531_v48 }
 0x723   :  { %3293 = vmatpush3.bf16.msra.mxu1 %v3762_v38  ;;  %3034 = vmatprep.mubr.msk.f32.mxu1 %vm3532_vm8, %v3533_v49 }
 0x724   :  { %3024 = vmatmul.mubr.msk.f32.vlgmr.msra.gmra.mrb[10].mxu0 %vm378_vm13, %v831_v46  ;;  %3294 = vmatprep.subr.bf16.mxu1 %v3531_v48 }
 0x725   :  { %3299 = vmatpush3.bf16.msra.mxu0 %v3780_v43  ;;  %3045 = vmatprep.mubr.msk.f32.mxu0 %vm3532_vm8, %v3533_v49 }
 0x726   :  { %3300 = vmatprep.subr.bf16.mxu0 %v3531_v48 }
 0x727   :  { %3296 = vmatpush3.bf16.msra.mxu1 %v3768_v40 }
 0x728   :  { %3303 = vmatprep.subr.bf16.mxu1 %v3531_v48 }
 0x729   :  { %3302 = vmatpush3.bf16.msra.mxu0 %v3794_v47 }
 0x72a   :  { %3309 = vmatprep.subr.bf16.mxu0 %v3531_v48 }
 0x7ef   :  { %v796_v50 = vpop.f32.mrb[8].mxu0 }
 0x7f0   :  { %v3003_v51 = vpop.f32.mrb[9].mxu0 }
 0x7f5   :  { %v900_v52 = vpop.f32.mrb[16].mxu1 }
 0x7f6   :  { %v901_v54 = vadd.f32 %v900_v52, %v796_v50  ;;  %v3014_v55 = vpop.f32.mrb[17].mxu1 }
 0x7f7   :  { %v999_v57 = vpop.f32.mrb[10].mxu0 }
 0x7f8   :  { %v904_v59 = vadd.f32 %v3819_v56, %v901_v54  ;;  %v1078_v60 = vadd.f32 %v999_v57, %v3728_v7  ;;  %v3025_v61 = vpop.f32.mrb[11].mxu0 }
 0x7fa   :  { %v905_v62 = vmul.f32 2.0, %v904_v59  ;;  %v1079_v63 = vmul.f32 2.0, %v1078_v60 }
 0x7fc   :  { %v906_v0 = vsel %vm3740_vm12, %v905_v62, %v904_v59  ;;  %v1080_v1 = vsel %vm3740_vm12, %v1079_v63, %v1078_v60 }
 0x7fd   :  { %v2688_v3 = vmul.f32 -1.442695, %v906_v0  ;;  %v2692_v4 = vmul.f32 -1.442695, %v1080_v1 }
 0x7ff   :  { %3422 = vpow2.f32 %v2688_v3 }
 0x800   :  { %3424 = vpow2.f32 %v2692_v4 }
 0x809   :  { %v3423_v6 = vpop.eup %3422 }
 0x80a   :  { %v3425_v8 = vpop.eup %3424  ;;  %v910_v10 = vadd.f32 1.0, %v3423_v6 }
 0x80b   :  { %v1084_v12 = vadd.f32 1.0, %v3425_v8 }
 0x80c   :  { %3426 = vrcp.f32 %v910_v10 }
 0x80d   :  { %3428 = vrcp.f32 %v1084_v12 }
 0x816   :  { %v3427_v7 = vpop.eup %3426 }
 0x817   :  { %v3429_v14 = vpop.eup %3428  ;;  %v913_v16 = vmul.f32 2.0, %v3427_v7 }
 0x818   :  { %v1087_v17 = vmul.f32 2.0, %v3429_v14 }
 0x819   :  { %v2689_v18 = vadd.f32 -1.0, %v913_v16 }
 0x81a   :  { %v2693_v19 = vadd.f32 -1.0, %v1087_v17 }
 0x81b   :  { %v915_v21 = vsel %vm3740_vm12, %v2689_v18, %v3427_v7 }
 0x81c   :  { %v1089_v2 = vsel %vm3740_vm12, %v2693_v19, %v3429_v14  ;;  %918 = vrot.lane.b32.xlu0 %v915_v21, %s3534_s4  ;;  %v916_v26 = vmul.f32 %v915_v21, %v3835_v32 }
 0x81d   :  { %1092 = vrot.lane.b32.xlu1 %v1089_v2, %s3534_s4  ;;  %v1090_v27 = vmul.f32 %v1089_v2, %v3839_v36 }
 0x88e   :  { %v919_v22 = vpop.permute.xlu0 %918 }
 0x88f   :  { %v1093_v23 = vpop.permute.xlu1 %1092  ;;  %v921_v24 = vmul.f32 %v919_v22, %v915_v21 }
 0x890   :  { %v1095_v25 = vmul.f32 %v1093_v23, %v1089_v2 }
 0x891   :  { %923 = vrot.lane.b32.xlu0 %v921_v24, %s3535_s30 }
 0x892   :  { %1097 = vrot.lane.b32.xlu1 %v1095_v25, %s3535_s30 }
 0x903   :  { %v924_v28 = vpop.permute.xlu0 %923 }
 0x904   :  { %v1098_v29 = vpop.permute.xlu1 %1097  ;;  %v3883_v30 = vadd.f32 %v924_v28, %v916_v26 }
 0x905   :  { %v3885_v31 = vadd.f32 %v1098_v29, %v1090_v27 }
 0x906   :  { %3430 = vtanh.f32 %v3883_v30 }
 0x907   :  { %3432 = vtanh.f32 %v3885_v31 }
 0x910   :  { %v3431_v33 = vpop.eup %3430 }
 0x911   :  { %v3433_v35 = vpop.eup %3432  ;;  %929 = vrot.lane.b32.xlu0 %v3431_v33, %s3534_s4 }
 0x912   :  { %1103 = vrot.lane.b32.xlu1 %v3433_v35, %s3534_s4 }
 0x983   :  { %v930_v37 = vpop.permute.xlu0 %929 }
 0x984   :  { %v1104_v32 = vpop.permute.xlu1 %1103  ;;  %v932_v39 = vmul.f32 %v930_v37, %v915_v21 }
 0x985   :  { %v1106_v36 = vmul.f32 %v1104_v32, %v1089_v2 }
 0x986   :  { %1004 = vrot.lane.b32.xlu0 %v932_v39, %s3535_s30 }
 0x987   :  { %1108 = vrot.lane.b32.xlu1 %v1106_v36, %s3535_s30 }
 0x9f8   :  { %v1005_v41 = vpop.permute.xlu0 %1004 }
 0x9f9   :  { %v1109_v42 = vpop.permute.xlu1 %1108  ;;  %3035 = vmatmul.mubr.msk.f32.vlgmr.msra.gmra.mrb[18].mxu1 %vm378_vm13, %v1005_v41 }
 0x9fa   :  { %3046 = vmatmul.mubr.msk.f32.vlgmr.msra.gmra.mrb[12].mxu0 %vm378_vm13, %v1109_v42  ;;  %3305 = vmatpush3.bf16.msra.mxu1 %v3694_v53 }
 0x9fb   :  { %3306 = vmatprep.subr.bf16.mxu1 %v3531_v48  ;;  %3056 = vmatprep.mubr.msk.f32.mxu1 %vm3532_vm8, %v3533_v49 }
 0x9fc   :  { %3311 = vmatpush3.bf16.msra.mxu0 %v3762_v38  ;;  %3067 = vmatprep.mubr.msk.f32.mxu0 %vm3532_vm8, %v3533_v49 }
 0x9fd   :  { %3312 = vmatprep.subr.bf16.mxu0 %v3531_v48 }
 0x9fe   :  { %3308 = vmatpush3.bf16.msra.mxu1 %v3705_v58 }
 0x9ff   :  { %3315 = vmatprep.subr.bf16.mxu1 %v3531_v48 }
 0xa00   :  { %3314 = vmatpush3.bf16.msra.mxu0 %v3768_v40 }
 0xa01   :  { %3057 = vmatmul.mubr.msk.f32.vlgmr.msra.gmra.mrb[20].mxu1 %vm378_vm13, %v1109_v42  ;;  %3321 = vmatprep.subr.bf16.mxu0 %v3531_v48 }
 0xa02   :  { %3317 = vmatpush3.bf16.msra.mxu1 %v3780_v43  ;;  %3078 = vmatprep.mubr.msk.f32.mxu1 %vm3532_vm8, %v3533_v49 }
 0xa03   :  { %3318 = vmatprep.subr.bf16.mxu1 %v3531_v48 }
 0xa06   :  { %3320 = vmatpush3.bf16.msra.mxu1 %v3794_v47 }
 0xa07   :  { %3327 = vmatprep.subr.bf16.mxu1 %v3531_v48 }
 0xacc   :  { %v1074_v44 = vpop.f32.mrb[18].mxu1 }
 0xacd   :  { %v1178_v45 = vpop.f32.mrb[12].mxu0  ;;  %v3036_v34 = vpop.f32.mrb[19].mxu1 }
 0xace   :  { %v1179_v46 = vadd.f32 %v1178_v45, %v1074_v44  ;;  %v3047_v50 = vpop.f32.mrb[13].mxu0 }
 0xad0   :  { %v1182_v51 = vadd.f32 %v3819_v56, %v1179_v46 }
 0xad2   :  { %v1183_v52 = vmul.f32 2.0, %v1182_v51 }
 0xad4   :  { %v1184_v54 = vsel %vm3740_vm12, %v1183_v52, %v1182_v51  ;;  %v1277_v55 = vpop.f32.mrb[20].mxu1 }
 0xad5   :  { %v2695_v57 = vmul.f32 -1.442695, %v1184_v54  ;;  %v1356_v59 = vadd.f32 %v1277_v55, %v3726_v5  ;;  %v3058_v60 = vpop.f32.mrb[21].mxu1 }
 0xad7   :  { %3434 = vpow2.f32 %v2695_v57  ;;  %v1357_v61 = vmul.f32 2.0, %v1356_v59 }
 0xad9   :  { %v1358_v62 = vsel %vm3740_vm12, %v1357_v61, %v1356_v59 }
 0xada   :  { %v2699_v63 = vmul.f32 -1.442695, %v1358_v62 }
 0xadc   :  { %3436 = vpow2.f32 %v2699_v63 }
 0xae1   :  { %v3435_v0 = vpop.eup %3434 }
 0xae2   :  { %v1188_v1 = vadd.f32 1.0, %v3435_v0 }
 0xae4   :  { %3438 = vrcp.f32 %v1188_v1 }
 0xae6   :  { %v3437_v3 = vpop.eup %3436 }
 0xae7   :  { %v1362_v4 = vadd.f32 1.0, %v3437_v3 }
 0xae9   :  { %3440 = vrcp.f32 %v1362_v4 }
 0xaee   :  { %v3439_v6 = vpop.eup %3438 }
 0xaef   :  { %v1191_v8 = vmul.f32 2.0, %v3439_v6 }
 0xaf1   :  { %v2696_v10 = vadd.f32 -1.0, %v1191_v8 }
 0xaf3   :  { %v3441_v12 = vpop.eup %3440  ;;  %v1193_v5 = vsel %vm3740_vm12, %v2696_v10, %v3439_v6 }
 0xaf4   :  { %1196 = vrot.lane.b32.xlu0 %v1193_v5, %s3534_s4  ;;  %v1365_v7 = vmul.f32 2.0, %v3441_v12  ;;  %v1194_v2 = vmul.f32 %v1193_v5, %v3883_v30 }
 0xaf6   :  { %v2700_v14 = vadd.f32 -1.0, %v1365_v7 }
 0xaf8   :  { %v1367_v16 = vsel %vm3740_vm12, %v2700_v14, %v3441_v12 }
 0xaf9   :  { %1370 = vrot.lane.b32.xlu1 %v1367_v16, %s3534_s4  ;;  %v1368_v24 = vmul.f32 %v1367_v16, %v3885_v31 }
 0xb66   :  { %v1197_v17 = vpop.permute.xlu0 %1196 }
 0xb67   :  { %v1199_v18 = vmul.f32 %v1197_v17, %v1193_v5 }
 0xb69   :  { %1201 = vrot.lane.b32.xlu0 %v1199_v18, %s3535_s30 }
 0xb6b   :  { %v1371_v19 = vpop.permute.xlu1 %1370 }
 0xb6c   :  { %v1373_v21 = vmul.f32 %v1371_v19, %v1367_v16 }
 0xb6e   :  { %1375 = vrot.lane.b32.xlu1 %v1373_v21, %s3535_s30 }
 0xbdb   :  { %v1202_v22 = vpop.permute.xlu0 %1201 }
 0xbdc   :  { %v3929_v23 = vadd.f32 %v1202_v22, %v1194_v2 }
 0xbde   :  { %3442 = vtanh.f32 %v3929_v23 }
 0xbe0   :  { %v1376_v25 = vpop.permute.xlu1 %1375 }
 0xbe1   :  { %v3933_v26 = vadd.f32 %v1376_v25, %v1368_v24 }
 0xbe3   :  { %3444 = vtanh.f32 %v3933_v26 }
 0xbe8   :  { %v3443_v27 = vpop.eup %3442 }
 0xbe9   :  { %1207 = vrot.lane.b32.xlu0 %v3443_v27, %s3534_s4 }
 0xbed   :  { %v3445_v28 = vpop.eup %3444 }
 0xbee   :  { %1381 = vrot.lane.b32.xlu1 %v3445_v28, %s3534_s4 }
 0xc5b   :  { %v1208_v29 = vpop.permute.xlu0 %1207 }
 0xc5c   :  { %v1210_v30 = vmul.f32 %v1208_v29, %v1193_v5 }
 0xc5e   :  { %1282 = vrot.lane.b32.xlu0 %v1210_v30, %s3535_s30 }
 0xc60   :  { %v1382_v33 = vpop.permute.xlu1 %1381 }
 0xc61   :  { %v1384_v35 = vmul.f32 %v1382_v33, %v1367_v16 }
 0xc63   :  { %1386 = vrot.lane.b32.xlu1 %v1384_v35, %s3535_s30 }
 0xcd0   :  { %v1283_v31 = vpop.permute.xlu0 %1282 }
 0xcd1   :  { %3068 = vmatmul.mubr.msk.f32.vlgmr.msra.gmra.mrb[14].mxu0 %vm378_vm13, %v1283_v31 }
 0xcd2   :  { %3323 = vmatpush3.bf16.msra.mxu0 %v3694_v53  ;;  %3089 = vmatprep.mubr.msk.f32.mxu0 %vm3532_vm8, %v3533_v49 }
 0xcd3   :  { %3324 = vmatprep.subr.bf16.mxu0 %v3531_v48 }
 0xcd5   :  { %v1387_v37 = vpop.permute.xlu1 %1386 }
 0xcd6   :  { %3326 = vmatpush3.bf16.msra.mxu0 %v3705_v58  ;;  %3079 = vmatmul.mubr.msk.f32.vlgmr.msra.gmra.mrb[22].mxu1 %vm378_vm13, %v1387_v37 }
 0xcd7   :  { %3329 = vmatpush3.bf16.msra.mxu1 %v3762_v38  ;;  %3333 = vmatprep.subr.bf16.mxu0 %v3531_v48 }
 0xcd8   :  { %3330 = vmatprep.subr.bf16.mxu1 %v3531_v48  ;;  %3100 = vmatprep.mubr.msk.f32.mxu1 %vm3532_vm8, %v3533_v49 }
 0xcd9   :  { %3090 = vmatmul.mubr.msk.f32.vlgmr.msra.gmra.mrb[16].mxu0 %vm378_vm13, %v1387_v37 }
 0xcda   :  { %3335 = vmatpush3.bf16.msra.mxu0 %v3780_v43  ;;  %3111 = vmatprep.mubr.msk.f32.mxu0 %vm3532_vm8, %v3533_v49 }
 0xcdb   :  { %3332 = vmatpush3.bf16.msra.mxu1 %v3768_v40  ;;  %3336 = vmatprep.subr.bf16.mxu0 %v3531_v48 }
 0xcdc   :  { %3339 = vmatprep.subr.bf16.mxu1 %v3531_v48 }
 0xcde   :  { %3338 = vmatpush3.bf16.msra.mxu0 %v3794_v47 }
 0xcdf   :  { %3345 = vmatprep.subr.bf16.mxu0 %v3531_v48 }
 0xda4   :  { %v1352_v32 = vpop.f32.mrb[14].mxu0 }
 0xda5   :  { %v3069_v39 = vpop.f32.mrb[15].mxu0 }
 0xda9   :  { %v1456_v36 = vpop.f32.mrb[22].mxu1 }
 0xdaa   :  { %v1457_v41 = vadd.f32 %v1456_v36, %v1352_v32  ;;  %v3080_v42 = vpop.f32.mrb[23].mxu1 }
 0xdac   :  { %v1460_v44 = vadd.f32 %v3819_v56, %v1457_v41  ;;  %v1555_v45 = vpop.f32.mrb[16].mxu0 }
 0xdad   :  { %v1634_v34 = vadd.f32 %v1555_v45, %v3732_v11  ;;  %v3091_v46 = vpop.f32.mrb[17].mxu0 }
 0xdae   :  { %v1461_v50 = vmul.f32 2.0, %v1460_v44 }
 0xdaf   :  { %v1635_v51 = vmul.f32 2.0, %v1634_v34 }
 0xdb0   :  { %v1462_v52 = vsel %vm3740_vm12, %v1461_v50, %v1460_v44 }
 0xdb1   :  { %v2702_v54 = vmul.f32 -1.442695, %v1462_v52  ;;  %v1636_v55 = vsel %vm3740_vm12, %v1635_v51, %v1634_v34 }
 0xdb2   :  { %v2706_v57 = vmul.f32 -1.442695, %v1636_v55 }
 0xdb3   :  { %3446 = vpow2.f32 %v2702_v54 }
 0xdb4   :  { %3448 = vpow2.f32 %v2706_v57 }
 0xdbd   :  { %v3447_v59 = vpop.eup %3446 }
 0xdbe   :  { %v3449_v60 = vpop.eup %3448  ;;  %v1466_v61 = vadd.f32 1.0, %v3447_v59 }
 0xdbf   :  { %v1640_v62 = vadd.f32 1.0, %v3449_v60 }
 0xdc0   :  { %3450 = vrcp.f32 %v1466_v61 }
 0xdc1   :  { %3452 = vrcp.f32 %v1640_v62 }
 0xdca   :  { %v3451_v11 = vpop.eup %3450 }
 0xdcb   :  { %v3453_v63 = vpop.eup %3452  ;;  %v1469_v0 = vmul.f32 2.0, %v3451_v11 }
 0xdcc   :  { %v1643_v1 = vmul.f32 2.0, %v3453_v63 }
 0xdcd   :  { %v2703_v3 = vadd.f32 -1.0, %v1469_v0 }
 0xdce   :  { %v2707_v4 = vadd.f32 -1.0, %v1643_v1 }
 0xdcf   :  { %v1471_v6 = vsel %vm3740_vm12, %v2703_v3, %v3451_v11 }
 0xdd0   :  { %v1645_v8 = vsel %vm3740_vm12, %v2707_v4, %v3453_v63  ;;  %1474 = vrot.lane.b32.xlu0 %v1471_v6, %s3534_s4  ;;  %v1472_v14 = vmul.f32 %v1471_v6, %v3929_v23 }
 0xdd1   :  { %1648 = vrot.lane.b32.xlu1 %v1645_v8, %s3534_s4  ;;  %v1646_v16 = vmul.f32 %v1645_v8, %v3933_v26 }
 0xe42   :  { %v1475_v10 = vpop.permute.xlu0 %1474 }
 0xe43   :  { %v1649_v12 = vpop.permute.xlu1 %1648  ;;  %v1477_v5 = vmul.f32 %v1475_v10, %v1471_v6 }
 0xe44   :  { %v1651_v7 = vmul.f32 %v1649_v12, %v1645_v8 }
 0xe45   :  { %1479 = vrot.lane.b32.xlu0 %v1477_v5, %s3535_s30 }
 0xe46   :  { %1653 = vrot.lane.b32.xlu1 %v1651_v7, %s3535_s30 }
 0xeb7   :  { %v1480_v17 = vpop.permute.xlu0 %1479 }
 0xeb8   :  { %v1654_v18 = vpop.permute.xlu1 %1653  ;;  %v3977_v19 = vadd.f32 %v1480_v17, %v1472_v14 }
 0xeb9   :  { %v3979_v21 = vadd.f32 %v1654_v18, %v1646_v16 }
 0xeba   :  { %3454 = vtanh.f32 %v3977_v19 }
 0xebb   :  { %3456 = vtanh.f32 %v3979_v21 }
 0xec4   :  { %v3455_v2 = vpop.eup %3454 }
 0xec5   :  { %v3457_v22 = vpop.eup %3456  ;;  %1485 = vrot.lane.b32.xlu0 %v3455_v2, %s3534_s4 }
 0xec6   :  { %1659 = vrot.lane.b32.xlu1 %v3457_v22, %s3534_s4 }
 0xf37   :  { %v1486_v24 = vpop.permute.xlu0 %1485 }
 0xf38   :  { %v1660_v23 = vpop.permute.xlu1 %1659  ;;  %v1488_v25 = vmul.f32 %v1486_v24, %v1471_v6 }
 0xf39   :  { %v1662_v26 = vmul.f32 %v1660_v23, %v1645_v8 }
 0xf3a   :  { %1560 = vrot.lane.b32.xlu0 %v1488_v25, %s3535_s30 }
 0xf3b   :  { %1664 = vrot.lane.b32.xlu1 %v1662_v26, %s3535_s30 }
 0xfac   :  { %v1561_v27 = vpop.permute.xlu0 %1560 }
 0xfad   :  { %v1665_v28 = vpop.permute.xlu1 %1664  ;;  %3101 = vmatmul.mubr.msk.f32.vlgmr.msra.gmra.mrb[24].mxu1 %vm378_vm13, %v1561_v27 }
 0xfae   :  { %3112 = vmatmul.mubr.msk.f32.vlgmr.msra.gmra.mrb[18].mxu0 %vm378_vm13, %v1665_v28  ;;  %3341 = vmatpush3.bf16.msra.mxu1 %v3694_v53 }
 0xfaf   :  { %3342 = vmatprep.subr.bf16.mxu1 %v3531_v48  ;;  %3122 = vmatprep.mubr.msk.f32.mxu1 %vm3532_vm8, %v3533_v49 }
 0xfb0   :  { %3347 = vmatpush3.bf16.msra.mxu0 %v3762_v38  ;;  %3133 = vmatprep.mubr.msk.f32.mxu0 %vm3532_vm8, %v3533_v49 }
 0xfb1   :  { %3348 = vmatprep.subr.bf16.mxu0 %v3531_v48 }
 0xfb2   :  { %3344 = vmatpush3.bf16.msra.mxu1 %v3705_v58 }
 0xfb3   :  { %3351 = vmatprep.subr.bf16.mxu1 %v3531_v48 }
 0xfb4   :  { %3350 = vmatpush3.bf16.msra.mxu0 %v3768_v40 }
 0xfb5   :  { %3123 = vmatmul.mubr.msk.f32.vlgmr.msra.gmra.mrb[26].mxu1 %vm378_vm13, %v1665_v28  ;;  %3357 = vmatprep.subr.bf16.mxu0 %v3531_v48 }
 0xfb6   :  { %3353 = vmatpush3.bf16.msra.mxu1 %v3780_v43  ;;  %3144 = vmatprep.mubr.msk.f32.mxu1 %vm3532_vm8, %v3533_v49 }
 0xfb7   :  { %3354 = vmatprep.subr.bf16.mxu1 %v3531_v48 }
 0xfba   :  { %3356 = vmatpush3.bf16.msra.mxu1 %v3794_v47 }
 0xfbb   :  { %3363 = vmatprep.subr.bf16.mxu1 %v3531_v48 }
0x1080   :  { %v1630_v29 = vpop.f32.mrb[24].mxu1 }
0x1081   :  { %v1734_v30 = vpop.f32.mrb[18].mxu0  ;;  %v3102_v33 = vpop.f32.mrb[25].mxu1 }
0x1082   :  { %v1735_v35 = vadd.f32 %v1734_v30, %v1630_v29  ;;  %v3113_v31 = vpop.f32.mrb[19].mxu0 }
0x1084   :  { %v1738_v37 = vadd.f32 %v3819_v56, %v1735_v35 }
0x1086   :  { %v1739_v32 = vmul.f32 2.0, %v1738_v37 }
0x1088   :  { %v1740_v39 = vsel %vm3740_vm12, %v1739_v32, %v1738_v37  ;;  %v1833_v36 = vpop.f32.mrb[26].mxu1 }
0x1089   :  { %v2709_v41 = vmul.f32 -1.442695, %v1740_v39  ;;  %v1912_v42 = vadd.f32 %v1833_v36, %v3730_v9  ;;  %v3124_v44 = vpop.f32.mrb[27].mxu1 }
0x108b   :  { %3458 = vpow2.f32 %v2709_v41  ;;  %v1913_v45 = vmul.f32 2.0, %v1912_v42 }
0x108d   :  { %v1914_v34 = vsel %vm3740_vm12, %v1913_v45, %v1912_v42 }
0x108e   :  { %v2713_v46 = vmul.f32 -1.442695, %v1914_v34 }
0x1090   :  { %3460 = vpow2.f32 %v2713_v46 }
0x1095   :  { %v3459_v50 = vpop.eup %3458 }
0x1096   :  { %v1744_v51 = vadd.f32 1.0, %v3459_v50 }
0x1098   :  { %3462 = vrcp.f32 %v1744_v51 }
0x109a   :  { %v3461_v52 = vpop.eup %3460 }
0x109b   :  { %v1918_v54 = vadd.f32 1.0, %v3461_v52 }
0x109d   :  { %3464 = vrcp.f32 %v1918_v54 }
0x10a2   :  { %v3463_v55 = vpop.eup %3462 }
0x10a3   :  { %v1747_v57 = vmul.f32 2.0, %v3463_v55 }
0x10a5   :  { %v2710_v59 = vadd.f32 -1.0, %v1747_v57 }
0x10a7   :  { %v3465_v60 = vpop.eup %3464  ;;  %v1749_v9 = vsel %vm3740_vm12, %v2710_v59, %v3463_v55 }
0x10a8   :  { %1752 = vrot.lane.b32.xlu0 %v1749_v9, %s3534_s4  ;;  %v1921_v61 = vmul.f32 2.0, %v3465_v60  ;;  %v1750_v4 = vmul.f32 %v1749_v9, %v3977_v19 }
0x10aa   :  { %v2714_v62 = vadd.f32 -1.0, %v1921_v61 }
0x10ac   :  { %v1923_v11 = vsel %vm3740_vm12, %v2714_v62, %v3465_v60 }
0x10ad   :  { %1926 = vrot.lane.b32.xlu1 %v1923_v11, %s3534_s4  ;;  %v1924_v10 = vmul.f32 %v1923_v11, %v3979_v21 }
0x111a   :  { %v1753_v63 = vpop.permute.xlu0 %1752 }
0x111b   :  { %v1755_v0 = vmul.f32 %v1753_v63, %v1749_v9 }
0x111d   :  { %1757 = vrot.lane.b32.xlu0 %v1755_v0, %s3535_s30 }
0x111f   :  { %v1927_v1 = vpop.permute.xlu1 %1926 }
0x1120   :  { %v1929_v3 = vmul.f32 %v1927_v1, %v1923_v11 }
0x1122   :  { %1931 = vrot.lane.b32.xlu1 %v1929_v3, %s3535_s30 }
0x118f   :  { %v1758_v6 = vpop.permute.xlu0 %1757 }
0x1190   :  { %v4023_v8 = vadd.f32 %v1758_v6, %v1750_v4 }
0x1192   :  { %3466 = vtanh.f32 %v4023_v8 }
0x1194   :  { %v1932_v12 = vpop.permute.xlu1 %1931 }
0x1195   :  { %v4027_v5 = vadd.f32 %v1932_v12, %v1924_v10 }
0x1197   :  { %3468 = vtanh.f32 %v4027_v5 }
0x119c   :  { %v3467_v7 = vpop.eup %3466 }
0x119d   :  { %1763 = vrot.lane.b32.xlu0 %v3467_v7, %s3534_s4 }
0x11a1   :  { %v3469_v14 = vpop.eup %3468 }
0x11a2   :  { %1937 = vrot.lane.b32.xlu1 %v3469_v14, %s3534_s4 }
0x120f   :  { %v1764_v16 = vpop.permute.xlu0 %1763 }
0x1210   :  { %v1766_v17 = vmul.f32 %v1764_v16, %v1749_v9 }
0x1212   :  { %1838 = vrot.lane.b32.xlu0 %v1766_v17, %s3535_s30 }
0x1214   :  { %v1938_v18 = vpop.permute.xlu1 %1937 }
0x1215   :  { %v1940_v19 = vmul.f32 %v1938_v18, %v1923_v11 }
0x1217   :  { %1942 = vrot.lane.b32.xlu1 %v1940_v19, %s3535_s30 }
0x1284   :  { %v1839_v21 = vpop.permute.xlu0 %1838 }
0x1285   :  { %3134 = vmatmul.mubr.msk.f32.vlgmr.msra.gmra.mrb[20].mxu0 %vm378_vm13, %v1839_v21 }
0x1286   :  { %3359 = vmatpush3.bf16.msra.mxu0 %v3694_v53  ;;  %3155 = vmatprep.mubr.msk.f32.mxu0 %vm3532_vm8, %v3533_v49 }
0x1287   :  { %3360 = vmatprep.subr.bf16.mxu0 %v3531_v48 }
0x1289   :  { %v1943_v2 = vpop.permute.xlu1 %1942 }
0x128a   :  { %3362 = vmatpush3.bf16.msra.mxu0 %v3705_v58  ;;  %3145 = vmatmul.mubr.msk.f32.vlgmr.msra.gmra.mrb[28].mxu1 %vm378_vm13, %v1943_v2 }
0x128b   :  { %3365 = vmatpush3.bf16.msra.mxu1 %v3762_v38  ;;  %3369 = vmatprep.subr.bf16.mxu0 %v3531_v48 }
0x128c   :  { %3366 = vmatprep.subr.bf16.mxu1 %v3531_v48  ;;  %3166 = vmatprep.mubr.msk.f32.mxu1 %vm3532_vm8, %v3533_v49 }
0x128d   :  { %3156 = vmatmul.mubr.msk.f32.vlgmr.msra.gmra.mrb[22].mxu0 %vm378_vm13, %v1943_v2 }
0x128e   :  { %3371 = vmatpush3.bf16.msra.mxu0 %v3780_v43  ;;  %3177 = vmatprep.mubr.msk.f32.mxu0 %vm3532_vm8, %v3533_v49 }
0x128f   :  { %3368 = vmatpush3.bf16.msra.mxu1 %v3768_v40  ;;  %3372 = vmatprep.subr.bf16.mxu0 %v3531_v48 }
0x1290   :  { %3375 = vmatprep.subr.bf16.mxu1 %v3531_v48 }
0x1292   :  { %3374 = vmatpush3.bf16.msra.mxu0 %v3794_v47 }
0x1293   :  { %3381 = vmatprep.subr.bf16.mxu0 %v3531_v48 }
0x1358   :  { %v1908_v22 = vpop.f32.mrb[20].mxu0 }
0x1359   :  { %v3135_v24 = vpop.f32.mrb[21].mxu0 }
0x135d   :  { %v2012_v23 = vpop.f32.mrb[28].mxu1 }
0x135e   :  { %v2013_v25 = vadd.f32 %v2012_v23, %v1908_v22  ;;  %v3146_v26 = vpop.f32.mrb[29].mxu1 }
0x1360   :  { %v2016_v27 = vadd.f32 %v3819_v56, %v2013_v25  ;;  %v2111_v28 = vpop.f32.mrb[22].mxu0 }
0x1361   :  { %v2190_v29 = vadd.f32 %v2111_v28, %v3736_v15  ;;  %v3157_v30 = vpop.f32.mrb[23].mxu0 }
0x1362   :  { %v2017_v33 = vmul.f32 2.0, %v2016_v27 }
0x1363   :  { %v2191_v35 = vmul.f32 2.0, %v2190_v29 }
0x1364   :  { %v2018_v31 = vsel %vm3740_vm12, %v2017_v33, %v2016_v27 }
0x1365   :  { %v2716_v37 = vmul.f32 -1.442695, %v2018_v31  ;;  %v2192_v32 = vsel %vm3740_vm12, %v2191_v35, %v2190_v29 }
0x1366   :  { %v2720_v39 = vmul.f32 -1.442695, %v2192_v32 }
0x1367   :  { %3470 = vpow2.f32 %v2716_v37 }
0x1368   :  { %3472 = vpow2.f32 %v2720_v39 }
0x1371   :  { %v3471_v36 = vpop.eup %3470 }
0x1372   :  { %v3473_v41 = vpop.eup %3472  ;;  %v2022_v42 = vadd.f32 1.0, %v3471_v36 }
0x1373   :  { %v2196_v44 = vadd.f32 1.0, %v3473_v41 }
0x1374   :  { %3474 = vrcp.f32 %v2022_v42 }
0x1375   :  { %3476 = vrcp.f32 %v2196_v44 }
0x137e   :  { %v3475_v15 = vpop.eup %3474 }
0x137f   :  { %v3477_v45 = vpop.eup %3476  ;;  %v2025_v34 = vmul.f32 2.0, %v3475_v15 }
0x1380   :  { %v2199_v46 = vmul.f32 2.0, %v3477_v45 }
0x1381   :  { %v2717_v50 = vadd.f32 -1.0, %v2025_v34 }
0x1382   :  { %v2721_v51 = vadd.f32 -1.0, %v2199_v46 }
0x1383   :  { %v2027_v52 = vsel %vm3740_vm12, %v2717_v50, %v3475_v15 }
0x1384   :  { %2030 = vrot.lane.b32.xlu0 %v2027_v52, %s3534_s4  ;;  %v2201_v54 = vsel %vm3740_vm12, %v2721_v51, %v3477_v45  ;;  %v2028_v9 = vmul.f32 %v2027_v52, %v4023_v8 }
0x1385   :  { %2204 = vrot.lane.b32.xlu1 %v2201_v54, %s3534_s4  ;;  %v2202_v62 = vmul.f32 %v2201_v54, %v4027_v5 }
0x13f6   :  { %v2031_v55 = vpop.permute.xlu0 %2030 }
0x13f7   :  { %v2033_v57 = vmul.f32 %v2031_v55, %v2027_v52  ;;  %v2205_v59 = vpop.permute.xlu1 %2204 }
0x13f8   :  { %v2207_v60 = vmul.f32 %v2205_v59, %v2201_v54 }
0x13f9   :  { %2035 = vrot.lane.b32.xlu0 %v2033_v57, %s3535_s30 }
0x13fa   :  { %2209 = vrot.lane.b32.xlu1 %v2207_v60, %s3535_s30 }
0x146b   :  { %v2036_v61 = vpop.permute.xlu0 %2035 }
0x146c   :  { %v4071_v11 = vadd.f32 %v2036_v61, %v2028_v9  ;;  %v2210_v63 = vpop.permute.xlu1 %2209  ;;  %v3504_v61 = vld [vmem:[%s4156_s7] ss:$0 sm:$0xff] }
0x146d   :  { %v4073_v0 = vadd.f32 %v2210_v63, %v2202_v62 }
0x146e   :  { %3478 = vtanh.f32 %v4071_v11 }
0x146f   :  { %3480 = vtanh.f32 %v4073_v0 }
0x1478   :  { %v3479_v1 = vpop.eup %3478 }
0x1479   :  { %v3481_v3 = vpop.eup %3480  ;;  %2041 = vrot.lane.b32.xlu0 %v3479_v1, %s3534_s4 }
0x147a   :  { %2215 = vrot.lane.b32.xlu1 %v3481_v3, %s3534_s4 }
0x14eb   :  { %v2042_v4 = vpop.permute.xlu0 %2041 }
0x14ec   :  { %v2044_v6 = vmul.f32 %v2042_v4, %v2027_v52  ;;  %v2216_v8 = vpop.permute.xlu1 %2215 }
0x14ed   :  { %v2218_v10 = vmul.f32 %v2216_v8, %v2201_v54 }
0x14ee   :  { %2116 = vrot.lane.b32.xlu0 %v2044_v6, %s3535_s30 }
0x14ef   :  { %2220 = vrot.lane.b32.xlu1 %v2218_v10, %s3535_s30 }
0x1560   :  { %v2117_v12 = vpop.permute.xlu0 %2116 }
0x1561   :  { %v2221_v5 = vpop.permute.xlu1 %2220  ;;  %3167 = vmatmul.mubr.msk.f32.vlgmr.msra.gmra.mrb[30].mxu1 %vm378_vm13, %v2117_v12 }
0x1562   :  { %3178 = vmatmul.mubr.msk.f32.vlgmr.msra.gmra.mrb[24].mxu0 %vm378_vm13, %v2221_v5  ;;  %3377 = vmatpush3.bf16.msra.mxu1 %v3694_v53 }
0x1563   :  { %3378 = vmatprep.subr.bf16.mxu1 %v3531_v48  ;;  %3188 = vmatprep.mubr.msk.f32.mxu1 %vm3532_vm8, %v3533_v49 }
0x1564   :  { %3383 = vmatpush3.bf16.msra.mxu0 %v3762_v38  ;;  %3199 = vmatprep.mubr.msk.f32.mxu0 %vm3532_vm8, %v3533_v49 }
0x1565   :  { %3384 = vmatprep.subr.bf16.mxu0 %v3531_v48 }
0x1566   :  { %3380 = vmatpush3.bf16.msra.mxu1 %v3705_v58 }
0x1567   :  { %3387 = vmatprep.subr.bf16.mxu1 %v3531_v48 }
0x1568   :  { %3386 = vmatpush3.bf16.msra.mxu0 %v3768_v40 }
0x1569   :  { %3189 = vmatmul.mubr.msk.f32.vlgmr.msra.gmra.mrb[32].mxu1 %vm378_vm13, %v2221_v5 }
0x156a   :  { %3389 = vmatpush3.bf16.msra.mxu1 %v3780_v43  ;;  %3210 = vmatprep.mubr.msk.f32.mxu1 %vm3532_vm8, %v3533_v49 }
0x156b   :  { %3390 = vmatprep.subr.bf16.mxu1 %v3531_v48 }
0x156e   :  { %3392 = vmatpush3.bf16.msra.mxu1 %v3794_v47 }
0x1634   :  { %v2186_v53 = vpop.f32.mrb[30].mxu1 }
0x1635   :  { %v2290_v38 = vpop.f32.mrb[24].mxu0  ;;  %v3168_v7 = vpop.f32.mrb[31].mxu1 }
0x1636   :  { %v2291_v14 = vadd.f32 %v2290_v38, %v2186_v53  ;;  %v3179_v58 = vpop.f32.mrb[25].mxu0  ;;  %v2732_v53 = vld [vmem:[%s4157_s8] ss:$0 sm:$0xff]  ;;  %s3537_s8 = smov [#allocation3]  }
0x1637   :  { %s2644_s27 = sshll.u32 %s3537_s8, 4  ;;  %s2645_s27 = int_to_ptr.vmem [resolvable:$true] %s2644_s27 }
0x1638   :  { %v2294_v16 = vadd.f32 %v3819_v56, %v2291_v14  ;;  %s3505_s28 = scalar_lea.vmem %s2645_s27, 128  ;;  %p3510_p1 = scmp.lt.s32.totalorder %s2645_s27, %s2645_s27 }
0x1639   :  { %p3506_p0 = scmp.ne.s32.totalorder %s2645_s27, %s3505_s28  ;;  %p3511_p2 = scmp.lt.s32.totalorder %s3505_s28, %s3505_s28 }
0x163a   :  { %v2295_v17 = vmul.f32 2.0, %v2294_v16 }
0x163b   :  { %p3512_p3 = por %p3511_p2, %p3510_p1 }
0x163c   :  { %v2296_v40 = vsel %vm3740_vm12, %v2295_v17, %v2294_v16  ;;  %v2389_v18 = vpop.f32.mrb[32].mxu1 }
0x163d   :  { %v2723_v43 = vmul.f32 -1.442695, %v2296_v40  ;;  %v2468_v19 = vadd.f32 %v2389_v18, %v3734_v13  ;;  %v3190_v49 = vpop.f32.mrb[33].mxu1  ;;  %p3513_p4 = pnand %p3512_p3, %p3506_p0 }
0x163f   :  { %3482 = vpow2.f32 %v2723_v43  ;;  %v2469_v48 = vmul.f32 2.0, %v2468_v19 }
0x1641   :  { %v2470_v47 = vsel %vm3740_vm12, %v2469_v48, %v2468_v19  ;;  %v2733_v19 = vld [vmem:[#allocation2] ss:$0 sm:$0xff] }
0x1642   :  { %v2727_v21 = vmul.f32 -1.442695, %v2470_v47 }
0x1644   :  { %3484 = vpow2.f32 %v2727_v21 }
0x1649   :  { %v3483_v2 = vpop.eup %3482 }
0x164a   :  { %v2300_v22 = vadd.f32 1.0, %v3483_v2 }
0x164c   :  { %3486 = vrcp.f32 %v2300_v22 }
0x164e   :  { %v3485_v56 = vpop.eup %3484 }
0x164f   :  { %v2474_v24 = vadd.f32 1.0, %v3485_v56 }
0x1651   :  { %3488 = vrcp.f32 %v2474_v24 }
0x1656   :  { %v3487_v23 = vpop.eup %3486 }
0x1657   :  { %v2303_v25 = vmul.f32 2.0, %v3487_v23 }
0x1659   :  { %v2724_v26 = vadd.f32 -1.0, %v2303_v25 }
0x165b   :  { %v3489_v27 = vpop.eup %3488  ;;  %v2305_v13 = vsel %vm3740_vm12, %v2724_v26, %v3487_v23 }
0x165c   :  { %2308 = vrot.lane.b32.xlu0 %v2305_v13, %s3534_s4  ;;  %v2477_v28 = vmul.f32 2.0, %v3489_v27  ;;  %v2306_v32 = vmul.f32 %v2305_v13, %v4071_v11 }
0x165e   :  { %v2728_v29 = vadd.f32 -1.0, %v2477_v28 }
0x1660   :  { %v2479_v30 = vsel %vm3740_vm12, %v2728_v29, %v3489_v27 }
0x1661   :  { %2482 = vrot.lane.b32.xlu1 %v2479_v30, %s3534_s4  ;;  %v2480_v41 = vmul.f32 %v2479_v30, %v4073_v0 }
0x16ce   :  { %v2309_v33 = vpop.permute.xlu0 %2308 }
0x16cf   :  { %v2311_v35 = vmul.f32 %v2309_v33, %v2305_v13 }
0x16d1   :  { %2313 = vrot.lane.b32.xlu0 %v2311_v35, %s3535_s30 }
0x16d3   :  { %v2483_v31 = vpop.permute.xlu1 %2482 }
0x16d4   :  { %v2485_v37 = vmul.f32 %v2483_v31, %v2479_v30 }
0x16d6   :  { %2487 = vrot.lane.b32.xlu1 %v2485_v37, %s3535_s30 }
0x1743   :  { %v2314_v39 = vpop.permute.xlu0 %2313 }
0x1744   :  { %v2316_v36 = vadd.f32 %v2314_v39, %v2306_v32 }
0x1746   :  { %3490 = vtanh.f32 %v2316_v36 }
0x1748   :  { %v2488_v42 = vpop.permute.xlu1 %2487 }
0x1749   :  { %v2490_v44 = vadd.f32 %v2488_v42, %v2480_v41 }
0x174b   :  { %3492 = vtanh.f32 %v2490_v44 }
0x1750   :  { %v3491_v15 = vpop.eup %3490 }
0x1751   :  { %2319 = vrot.lane.b32.xlu0 %v3491_v15, %s3534_s4 }
0x1755   :  { %v3493_v45 = vpop.eup %3492 }
0x1756   :  { %2493 = vrot.lane.b32.xlu1 %v3493_v45, %s3534_s4 }
0x17c3   :  { %v2320_v34 = vpop.permute.xlu0 %2319 }
0x17c4   :  { %v2322_v46 = vmul.f32 %v2320_v34, %v2305_v13 }
0x17c6   :  { %2394 = vrot.lane.b32.xlu0 %v2322_v46, %s3535_s30 }
0x17c8   :  { %v2494_v50 = vpop.permute.xlu1 %2493 }
0x17c9   :  { %v2496_v51 = vmul.f32 %v2494_v50, %v2479_v30 }
0x17cb   :  { %2498 = vrot.lane.b32.xlu1 %v2496_v51, %s3535_s30 }
0x1838   :  { %v2395_v52 = vpop.permute.xlu0 %2394 }
0x1839   :  { %3200 = vmatmul.mubr.msk.f32.vlgmr.msra.gmra.mrb[26].mxu0 %vm378_vm13, %v2395_v52 }
0x183d   :  { %v2499_v54 = vpop.permute.xlu1 %2498 }
0x183e   :  { %3211 = vmatmul.mubr.msk.f32.vlgmr.msra.gmra.mrb[34].mxu1 %vm378_vm13, %v2499_v54 }
0x190c   :  { %v2464_v55 = vpop.f32.mrb[26].mxu0 }
0x190d   :  { %v3201_v57 = vpop.f32.mrb[27].mxu0 }
0x1911   :  { %v2568_v59 = vpop.f32.mrb[34].mxu1 }
0x1912   :  { %v2569_v60 = vadd.f32 %v2568_v59, %v2464_v55  ;;  %v3212_v9 = vpop.f32.mrb[35].mxu1 }
0x1914   :  { %v2572_v62 = vadd.f32 %v3504_v61, %v2569_v60 }
0x1916   :  { %v2573_v11 = vmul.f32 2.0, %v2572_v62 }
0x1918   :  { %v2574_v63 = vsel %vm3740_vm12, %v2573_v11, %v2572_v62 }
0x1919   :  { %v2730_v0 = vmul.f32 -1.442695, %v2574_v63 }
0x191b   :  { %3494 = vpow2.f32 %v2730_v0 }
0x1925   :  { %v3495_v1 = vpop.eup %3494 }
0x1926   :  { %v2578_v3 = vadd.f32 1.0, %v3495_v1 }
0x1928   :  { %3496 = vrcp.f32 %v2578_v3 }
0x1932   :  { %v3497_v4 = vpop.eup %3496 }
0x1933   :  { %v2581_v6 = vmul.f32 2.0, %v3497_v4 }
0x1935   :  { %v2731_v8 = vadd.f32 -1.0, %v2581_v6 }
0x1937   :  { %v2583_v10 = vsel %vm3740_vm12, %v2731_v8, %v3497_v4 }
0x1938   :  { %2586 = vrot.lane.b32.xlu0 %v2583_v10, %s3534_s4  ;;  %v2584_v38 = vmul.f32 %v2583_v10, %v2316_v36 }
0x19aa   :  { %v2587_v12 = vpop.permute.xlu0 %2586 }
0x19ab   :  { %v2589_v5 = vmul.f32 %v2587_v12, %v2583_v10 }
0x19ad   :  { %2591 = vrot.lane.b32.xlu1 %v2589_v5, %s3535_s30 }
0x19b1   :  { %2607 = vrot.lane.b32.xlu1 %v2732_v53, %s3536_s26 }
0x1a1f   :  { %v2592_v7 = vpop.permute.xlu1 %2591 }
0x1a20   :  { %v2594_v14 = vadd.f32 %v2592_v7, %v2584_v38 }
0x1a22   :  { %3498 = vtanh.f32 %v2594_v14 }
0x1a23   :  { %v2608_v16 = vpop.permute.xlu1 %2607 }
0x1a2c   :  { %v3499_v58 = vpop.eup %3498 }
0x1a2d   :  { %2597 = vrot.lane.b32.xlu0 %v3499_v58, %s3534_s4 }
0x1a9f   :  { %v2598_v20 = vpop.permute.xlu0 %2597 }
0x1aa0   :  { %v2600_v17 = vmul.f32 %v2598_v20, %v2583_v10 }
0x1aa2   :  { %v2610_v40 = vmul.f32 %v2608_v16, %v2600_v17 }
0x1aa4   :  { %2612 = vrot.lane.b32.xlu0 %v2610_v40, %s3535_s30 }
0x1b16   :  { %v2613_v18 = vpop.permute.xlu0 %2612 }
0x1b17   :  { %v2615_v43 = vsel %vm378_vm13, %v2613_v18, 0.0 }
0x1b18   :  { %2616 = vadd.xlane.f32.xlu1 %v2615_v43 }
0x1ba5   :  { %v2617_v49 = vpop.xlane.xlu1 %2616 }
0x1ba6   :  { %v2625_v48 = vadd.f32 %v2733_v19, %v2617_v49 }
0x1ba8   :  { %v2734_v47 = vmul.f32 -1.442695, %v2625_v48 }
0x1baa   :  { %3500 = vpow2.f32 %v2734_v47 }
0x1bb4   :  { %v3501_v21 = vpop.eup %3500 }
0x1bb5   :  { %v2629_v2 = vadd.f32 1.0, %v3501_v21 }
0x1bb7   :  { %3502 = vrcp.f32 %v2629_v2 }
0x1bc1   :  { %v3503_v22 = vpop.eup %3502 }
0x1bc2   :  { %2634 = vperm.xlu0 %3402, %v3503_v22  }
0x1c41   :  { %v2635_v56 = vpop.permute.xlu0 %2634 }
0x1c42   :  { %2637 = vst [vmem:[#allocation3] sm:$0xff] %v2635_v56 }
0x1c43   :  { %3516 = shalt.err (!%p3513_p4)
}
0x1c44   :  { %s3517_s4 = scalar_lea.hbm %s4159_s10, 128 }
0x1c45   :  { %p3518_p5 = scmp.ne.s32.totalorder %s4159_s10, %s3517_s4  ;;  %p3521_p6 = scmp.lt.u32.totalorder %s3517_s4, %s4159_s10 }
0x1c47   :  { %p3523_p7 = pnand %p3521_p6, %p3518_p5 }
0x1c49   :  { %3526 = shalt.err (!%p3523_p7)
}
0x1c4a   :  { %2647 = dma.vmem_to_hbm [thread:$0]  %s2645_s27, 128, %s4159_s10, [#allocation4]  }
0x1c4b   :  { %3527 = dma.done.wait [#allocation4], 128  }
0x1c4c   :  { %3528 = vsyncadd [#allocation4], 4294967168 }
0x1c4d   :  { %2651 = vsyncpa [#allocation4], 1 }

</bundles_post_ra>
